<compile_context>
chip_gen: v7x
topology: tpu7x:2x2x1
jax: 0.10.0
libtpu: 0.0.40
codegen_flags: <defaults>
</compile_context>

<pallas_src>
import functools

import jax
import jax.numpy as jnp
import numpy as np
from jax.experimental import pallas as pl
from jax.experimental.pallas import tpu as pltpu

_LN_EPS = 1e-5  # torch.nn.LayerNorm default


# --------------------------------- kernel ----------------------------------------
def _decoder_cell_kernel(x_ref, wqkv_ref, bqkv_ref, wo_ref, bo_ref,
                         g1_ref, beta1_ref, w1_ref, b1_ref, w2_ref, b2_ref,
                         g2_ref, beta2_ref, o_ref, *, n_head, d_head, scale):
    bf16 = jnp.bfloat16
    Bt, S, D = x_ref.shape
    hd = n_head * d_head
    R = Bt * S

    x = x_ref[...].reshape(R, D)                       # (Bt*S, D) f32 (cheap leading-dim merge)
    xb = x.astype(bf16)

    # ---- fused QKV projection: one wide bf16 MXU matmul, f32 accumulation ----
    qkv = jnp.dot(xb, wqkv_ref[...], preferred_element_type=jnp.float32) + bqkv_ref[...]
    qkv = qkv.reshape(Bt, S, 3 * hd)                   # lane-dense; heads stay in the lane axis

    wo = wo_ref[...]                                   # (hd, D) bf16, resident

    # ---- per-head scaled dot-product attention via static lane slices (no relayouts) ----
    # Output projection is accumulated per head against row slices of Wo, so no head-major
    # transpose and no concat across heads is ever materialised.
    z1 = None
    for h in range(n_head):
        q_h = qkv[:, :, h * d_head:(h + 1) * d_head].astype(bf16)                  # (Bt, S, dh)
        k_h = qkv[:, :, hd + h * d_head:hd + (h + 1) * d_head].astype(bf16)
        v_h = qkv[:, :, 2 * hd + h * d_head:2 * hd + (h + 1) * d_head].astype(bf16)

        s = jnp.einsum("bqd,bkd->bqk", q_h, k_h,
                       preferred_element_type=jnp.float32) * scale                 # (Bt, S, S) f32
        s = s - jnp.max(s, axis=-1, keepdims=True)
        p = jnp.exp(s)
        p = p * pl.reciprocal(jnp.sum(p, axis=-1, keepdims=True), approx=True)

        ctx = jnp.einsum("bqk,bkd->bqd", p.astype(bf16), v_h,
                         preferred_element_type=jnp.float32)                        # (Bt, S, dh)
        part = jnp.dot(ctx.reshape(R, d_head).astype(bf16),
                       wo[h * d_head:(h + 1) * d_head, :],
                       preferred_element_type=jnp.float32)                          # (Bt*S, D)
        z1 = part if z1 is None else z1 + part
    z1 = z1 + bo_ref[...]

    # ---- residual + LayerNorm 1 (f32; dropout is identity in inference) ----
    h1 = x + z1
    mu1 = jnp.mean(h1, axis=-1, keepdims=True)
    var1 = jnp.mean(jnp.square(h1 - mu1), axis=-1, keepdims=True)
    z2 = (h1 - mu1) * jax.lax.rsqrt(var1 + _LN_EPS) * g1_ref[...] + beta1_ref[...]

    # ---- position-wise feed-forward (bf16 operands, f32 accumulation / elementwise) ----
    ff = jnp.dot(z2.astype(bf16), w1_ref[...], preferred_element_type=jnp.float32) + b1_ref[...]
    ff = jnp.maximum(ff, 0.0)
    z3 = jnp.dot(ff.astype(bf16), w2_ref[...], preferred_element_type=jnp.float32) + b2_ref[...]

    # ---- residual + LayerNorm 2 (f32) ----
    h2 = z2 + z3
    mu2 = jnp.mean(h2, axis=-1, keepdims=True)
    var2 = jnp.mean(jnp.square(h2 - mu2), axis=-1, keepdims=True)
    y = (h2 - mu2) * jax.lax.rsqrt(var2 + _LN_EPS) * g2_ref[...] + beta2_ref[...]

    o_ref[...] = y.reshape(Bt, S, D).astype(o_ref.dtype)


# --------------------------------- wrapper ----------------------------------------
def _pick_block_batch(B, S, target_rows=256):
    """Largest divisor of B with Bt*S <= target_rows (256 fills the v6e/v7x MXU; 128-multiples
    are enough for v5e), while keeping >= 2 grid steps when B >= 2 so both v7x cores get work."""
    best = 1
    for bt in range(1, B + 1):
        if B % bt == 0 and bt * S <= target_rows:
            best = bt
    if B >= 2:
        while best > 1 and B // best < 2:
            best -= 1
            while best > 1 and B % best != 0:
                best -= 1
    return max(best, 1)


def pack_params(params):
    """One-time host-side packing (hoisted out of the forward path): fuse Q/K/V weights into a
    single (D, 3*H*dh) matrix and cast matmul weights to bf16; biases / LN params stay f32."""
    bf16 = jnp.bfloat16
    f32 = jnp.float32
    return dict(
        wqkv=jnp.concatenate([params["wq"], params["wk"], params["wv"]], axis=1).astype(bf16),
        bqkv=jnp.concatenate([params["bq"], params["bk"], params["bv"]], axis=1).astype(f32),
        wo=params["wo"].astype(bf16), bo=params["bo"].astype(f32),
        g1=params["g1"].astype(f32), beta1=params["beta1"].astype(f32),
        w1=params["w1"].astype(bf16), b1=params["b1"].astype(f32),
        w2=params["w2"].astype(bf16), b2=params["b2"].astype(f32),
        g2=params["g2"].astype(f32), beta2=params["beta2"].astype(f32),
    )


def decoder_cell(x, packed, *, n_head, block_batch=None):
    """x: (B, S, d_model) float32.  `packed` comes from pack_params() (weights (in, out) bf16)."""
    B, S, D = x.shape
    d_head = D // n_head
    scale = 1.0 / (d_head ** 0.5)
    Bt = block_batch or _pick_block_batch(B, S)
    assert B % Bt == 0, "block batch must divide B"

    names = ["wqkv", "bqkv", "wo", "bo", "g1", "beta1", "w1", "b1", "w2", "b2", "g2", "beta2"]
    operands = [x] + [packed[n] for n in names]

    in_specs = [pl.BlockSpec((Bt, S, D), lambda b: (b, 0, 0))]            # activations, tiled over B
    in_specs += [pl.BlockSpec(packed[n].shape, lambda b: (0, 0)) for n in names]  # weights resident

    kernel = functools.partial(_decoder_cell_kernel,
                               n_head=n_head, d_head=d_head, scale=scale)

    return pl.pallas_call(
        kernel,
        out_shape=jax.ShapeDtypeStruct((B, S, D), x.dtype),
        grid_spec=pltpu.PrefetchScalarGridSpec(
            num_scalar_prefetch=0,
            grid=(B // Bt,),
            in_specs=in_specs,
            out_specs=pl.BlockSpec((Bt, S, D), lambda b: (b, 0, 0)),
        ),
        compiler_params=pltpu.CompilerParams(
            dimension_semantics=("parallel",),
            vmem_limit_bytes=64 * 1024 * 1024,   # explicit cap: fits v7x physical VMEM
        ),
    )(*operands)


# ----------------------------- pure-JAX reference ---------------------------------
def _layer_norm(x, gamma, beta, eps=_LN_EPS):
    mu = jnp.mean(x, axis=-1, keepdims=True)
    var = jnp.mean(jnp.square(x - mu), axis=-1, keepdims=True)
    return (x - mu) / jnp.sqrt(var + eps) * gamma + beta


def _reference(x, params, *, n_head, matmul_dtype=jnp.float32):
    """Port of DecoderCell.forward(x, mask=None).  matmul_dtype=bfloat16 mirrors the kernel's
    bf16-operand / f32-accumulate matmuls; float32 is the exact torch semantics."""
    B, S, D = x.shape
    dh = D // n_head
    scale = 1.0 / dh ** 0.5

    def lin(a, w, b):
        return jnp.dot(a.astype(matmul_dtype), w.astype(matmul_dtype),
                       preferred_element_type=jnp.float32) + b

    q = lin(x, params["wq"], params["bq"]).reshape(B, S, n_head, dh).transpose(0, 2, 1, 3)
    k = lin(x, params["wk"], params["bk"]).reshape(B, S, n_head, dh).transpose(0, 2, 1, 3)
    v = lin(x, params["wv"], params["bv"]).reshape(B, S, n_head, dh).transpose(0, 2, 1, 3)
    s = jnp.einsum("bhqd,bhkd->bhqk", q.astype(matmul_dtype), k.astype(matmul_dtype),
                   preferred_element_type=jnp.float32) * scale
    p = jax.nn.softmax(s, axis=-1)
    ctx = jnp.einsum("bhqk,bhkd->bhqd", p.astype(matmul_dtype), v.astype(matmul_dtype),
                     preferred_element_type=jnp.float32)
    attn = ctx.transpose(0, 2, 1, 3).reshape(B, S, n_head * dh)
    z1 = lin(attn, params["wo"], params["bo"])
    z2 = _layer_norm(x + z1, params["g1"], params["beta1"])
    z3 = lin(jnp.maximum(lin(z2, params["w1"], params["b1"]), 0.0), params["w2"], params["b2"])
    return _layer_norm(z2 + z3, params["g2"], params["beta2"])


def init_params(key, d_model, n_head, d_ff):
    """Deterministic init mimicking torch.nn.Linear (uniform +-1/sqrt(fan_in)); weights stored
    pre-transposed as (in_features, out_features), biases as (1, out_features)."""
    dh = d_model // n_head

    def linear(k, fan_in, fan_out):
        kw, kb = jax.random.split(k)
        bound = 1.0 / np.sqrt(fan_in)
        w = jax.random.uniform(kw, (fan_in, fan_out), jnp.float32, -bound, bound)
        b = jax.random.uniform(kb, (1, fan_out), jnp.float32, -bound, bound)
        return w, b

    ks = jax.random.split(key, 10)
    wq, bq = linear(ks[0], d_model, n_head * dh)
    wk, bk = linear(ks[1], d_model, n_head * dh)
    wv, bv = linear(ks[2], d_model, n_head * dh)
    wo, bo = linear(ks[3], n_head * dh, d_model)
    w1, b1 = linear(ks[4], d_model, d_ff)
    w2, b2 = linear(ks[5], d_ff, d_model)
    g1 = 1.0 + 0.1 * jax.random.normal(ks[6], (1, d_model), jnp.float32)
    beta1 = 0.1 * jax.random.normal(ks[7], (1, d_model), jnp.float32)
    g2 = 1.0 + 0.1 * jax.random.normal(ks[8], (1, d_model), jnp.float32)
    beta2 = 0.1 * jax.random.normal(ks[9], (1, d_model), jnp.float32)
    return dict(wq=wq, bq=bq, wk=wk, bk=bk, wv=wv, bv=bv, wo=wo, bo=bo,
                g1=g1, beta1=beta1, w1=w1, b1=b1, w2=w2, b2=b2, g2=g2, beta2=beta2)


if __name__ == "__main__":
    # Small, lane-dense shapes (D and d_ff multiples of 128 per the store-path feedback).
    B, S, D = 2, 16, 128
    n_head, d_ff = 4, 256

    key = jax.random.PRNGKey(0)
    kx, kp = jax.random.split(key)
    x = jax.random.normal(kx, (B, S, D), dtype=jnp.float32)
    params = init_params(kp, D, n_head, d_ff)
    packed = pack_params(params)            # one-time packing, hoisted out of the forward path

    out = jax.block_until_ready(decoder_cell(x, packed, n_head=n_head))

    # Kernel numerics: bf16-operand matmuls with f32 accumulation -> compare against a reference
    # with the same matmul dtype (tight-ish), and against the pure-f32 torch semantics (loose).
    ref_mixed = _reference(x, params, n_head=n_head, matmul_dtype=jnp.bfloat16)
    np.testing.assert_allclose(np.asarray(out), np.asarray(ref_mixed), rtol=2e-2, atol=2e-2)
    ref_f32 = _reference(x, params, n_head=n_head, matmul_dtype=jnp.float32)
    np.testing.assert_allclose(np.asarray(out), np.asarray(ref_f32), rtol=1e-1, atol=1e-1)

    print("KERNEL_OK")
</pallas_src>

<mosaic_0001>
module attributes {stable_mosaic.version = 11 : i64} {
  func.func @_decoder_cell_kernel(%arg0: i32, %arg1: memref<1x16x128xf32, #tpu.memory_space<vmem>>, %arg2: memref<128x384xbf16, #tpu.memory_space<vmem>>, %arg3: memref<1x384xf32, #tpu.memory_space<vmem>>, %arg4: memref<128x128xbf16, #tpu.memory_space<vmem>>, %arg5: memref<1x128xf32, #tpu.memory_space<vmem>>, %arg6: memref<1x128xf32, #tpu.memory_space<vmem>>, %arg7: memref<1x128xf32, #tpu.memory_space<vmem>>, %arg8: memref<128x256xbf16, #tpu.memory_space<vmem>>, %arg9: memref<1x256xf32, #tpu.memory_space<vmem>>, %arg10: memref<256x128xbf16, #tpu.memory_space<vmem>>, %arg11: memref<1x128xf32, #tpu.memory_space<vmem>>, %arg12: memref<1x128xf32, #tpu.memory_space<vmem>>, %arg13: memref<1x128xf32, #tpu.memory_space<vmem>>, %arg14: memref<1x16x128xf32, #tpu.memory_space<vmem>>) attributes {dimension_semantics = [#tpu.dimension_semantics<parallel>], iteration_bounds = array<i64: 2>, scalar_prefetch = 0 : i64, scratch_operands = 0 : i64, tpu.core_type = #tpu.core_type<tc>, window_params = [{transform_indices = @transform_0, window_bounds = array<i64: 1, 16, 128>}, {pipeline_mode = #tpu.pipeline_mode<synchronous>, transform_indices = @transform_1, window_bounds = array<i64: 128, 384>}, {pipeline_mode = #tpu.pipeline_mode<synchronous>, transform_indices = @transform_2, window_bounds = array<i64: 1, 384>}, {pipeline_mode = #tpu.pipeline_mode<synchronous>, transform_indices = @transform_3, window_bounds = array<i64: 128, 128>}, {pipeline_mode = #tpu.pipeline_mode<synchronous>, transform_indices = @transform_4, window_bounds = array<i64: 1, 128>}, {pipeline_mode = #tpu.pipeline_mode<synchronous>, transform_indices = @transform_5, window_bounds = array<i64: 1, 128>}, {pipeline_mode = #tpu.pipeline_mode<synchronous>, transform_indices = @transform_6, window_bounds = array<i64: 1, 128>}, {pipeline_mode = #tpu.pipeline_mode<synchronous>, transform_indices = @transform_7, window_bounds = array<i64: 128, 256>}, {pipeline_mode = #tpu.pipeline_mode<synchronous>, transform_indices = @transform_8, window_bounds = array<i64: 1, 256>}, {pipeline_mode = #tpu.pipeline_mode<synchronous>, transform_indices = @transform_9, window_bounds = array<i64: 256, 128>}, {pipeline_mode = #tpu.pipeline_mode<synchronous>, transform_indices = @transform_10, window_bounds = array<i64: 1, 128>}, {pipeline_mode = #tpu.pipeline_mode<synchronous>, transform_indices = @transform_11, window_bounds = array<i64: 1, 128>}, {pipeline_mode = #tpu.pipeline_mode<synchronous>, transform_indices = @transform_12, window_bounds = array<i64: 1, 128>}, {transform_indices = @transform_13, window_bounds = array<i64: 1, 16, 128>}]} {
    %c0 = arith.constant 0 : index
    %c0_0 = arith.constant 0 : index
    %c0_1 = arith.constant 0 : index
    %0 = vector.load %arg1[%c0, %c0_0, %c0_1] : memref<1x16x128xf32, #tpu.memory_space<vmem>>, vector<1x16x128xf32>
    %1 = vector.shape_cast %0 : vector<1x16x128xf32> to vector<16x128xf32>
    %2 = arith.truncf %1 : vector<16x128xf32> to vector<16x128xbf16>
    %c0_2 = arith.constant 0 : index
    %c0_3 = arith.constant 0 : index
    %3 = vector.load %arg2[%c0_2, %c0_3] : memref<128x384xbf16, #tpu.memory_space<vmem>>, vector<128x384xbf16>
    %cst = arith.constant dense<0.000000e+00> : vector<16x384xf32>
    %4 = tpu.matmul %2, %3, %cst {dimension_numbers = #tpu.dot_dimension_numbers<[1], [0], [0], [1], [0, 0, 1, 1], [], []>} : vector<16x128xbf16>, vector<128x384xbf16>, vector<16x384xf32> -> vector<16x384xf32>
    %c0_4 = arith.constant 0 : index
    %c0_5 = arith.constant 0 : index
    %5 = vector.load %arg3[%c0_4, %c0_5] : memref<1x384xf32, #tpu.memory_space<vmem>>, vector<1x384xf32>
    %6 = vector.broadcast %5 : vector<1x384xf32> to vector<16x384xf32>
    %7 = arith.addf %4, %6 : vector<16x384xf32>
    %8 = vector.shape_cast %7 : vector<16x384xf32> to vector<1x16x384xf32>
    %c0_6 = arith.constant 0 : index
    %c0_7 = arith.constant 0 : index
    %9 = vector.load %arg4[%c0_6, %c0_7] : memref<128x128xbf16, #tpu.memory_space<vmem>>, vector<128x128xbf16>
    %10 = vector.extract_strided_slice %8 {offsets = [0, 0, 0], sizes = [1, 16, 32], strides = [1, 1, 1]} : vector<1x16x384xf32> to vector<1x16x32xf32>
    %11 = arith.truncf %10 : vector<1x16x32xf32> to vector<1x16x32xbf16>
    %12 = vector.extract_strided_slice %8 {offsets = [0, 0, 128], sizes = [1, 16, 32], strides = [1, 1, 1]} : vector<1x16x384xf32> to vector<1x16x32xf32>
    %13 = arith.truncf %12 : vector<1x16x32xf32> to vector<1x16x32xbf16>
    %14 = vector.extract_strided_slice %8 {offsets = [0, 0, 256], sizes = [1, 16, 32], strides = [1, 1, 1]} : vector<1x16x384xf32> to vector<1x16x32xf32>
    %15 = arith.truncf %14 : vector<1x16x32xf32> to vector<1x16x32xbf16>
    "tpu.trace_start"() <{level = 10 : i32, message = "bqd,bkd->bqk"}> : () -> ()
    %cst_8 = arith.constant dense<0.000000e+00> : vector<1x16x16xf32>
    %16 = tpu.matmul %11, %13, %cst_8 {dimension_numbers = #tpu.dot_dimension_numbers<[2], [2], [1], [1], [0, 0, 0, 1, 1, 1], [0], [0]>} : vector<1x16x32xbf16>, vector<1x16x32xbf16>, vector<1x16x16xf32> -> vector<1x16x16xf32>
    "tpu.trace_stop"() : () -> ()
    %cst_9 = arith.constant 0.176776692 : f32
    %17 = vector.broadcast %cst_9 : f32 to vector<1x16x16xf32>
    %18 = arith.mulf %16, %17 : vector<1x16x16xf32>
    %cst_10 = arith.constant dense<0xFF800000> : vector<1x16xf32>
    %19 = vector.multi_reduction <maximumf>, %18, %cst_10 [2] : vector<1x16x16xf32> to vector<1x16xf32>
    %20 = vector.shape_cast %19 : vector<1x16xf32> to vector<1x16x1xf32>
    %21 = vector.broadcast %20 : vector<1x16x1xf32> to vector<1x16x16xf32>
    %22 = arith.subf %18, %21 : vector<1x16x16xf32>
    %23 = math.exp %22 : vector<1x16x16xf32>
    %cst_11 = arith.constant dense<0.000000e+00> : vector<1x16xf32>
    %24 = vector.multi_reduction <add>, %23, %cst_11 [2] : vector<1x16x16xf32> to vector<1x16xf32>
    %25 = vector.shape_cast %24 : vector<1x16xf32> to vector<1x16x1xf32>
    %26 = tpu.reciprocal %25 {approx = true} : vector<1x16x1xf32> -> vector<1x16x1xf32>
    %27 = vector.broadcast %26 : vector<1x16x1xf32> to vector<1x16x16xf32>
    %28 = arith.mulf %23, %27 : vector<1x16x16xf32>
    %29 = arith.truncf %28 : vector<1x16x16xf32> to vector<1x16x16xbf16>
    "tpu.trace_start"() <{level = 10 : i32, message = "bqk,bkd->bqd"}> : () -> ()
    %cst_12 = arith.constant dense<0.000000e+00> : vector<1x16x32xf32>
    %30 = tpu.matmul %29, %15, %cst_12 {dimension_numbers = #tpu.dot_dimension_numbers<[2], [1], [1], [2], [0, 0, 0, 1, 1, 2], [0], [0]>} : vector<1x16x16xbf16>, vector<1x16x32xbf16>, vector<1x16x32xf32> -> vector<1x16x32xf32>
    "tpu.trace_stop"() : () -> ()
    %31 = vector.shape_cast %30 : vector<1x16x32xf32> to vector<16x32xf32>
    %32 = arith.truncf %31 : vector<16x32xf32> to vector<16x32xbf16>
    %33 = vector.extract_strided_slice %9 {offsets = [0, 0], sizes = [32, 128], strides = [1, 1]} : vector<128x128xbf16> to vector<32x128xbf16>
    %cst_13 = arith.constant dense<0.000000e+00> : vector<16x128xf32>
    %34 = tpu.matmul %32, %33, %cst_13 {dimension_numbers = #tpu.dot_dimension_numbers<[1], [0], [0], [1], [0, 0, 1, 1], [], []>} : vector<16x32xbf16>, vector<32x128xbf16>, vector<16x128xf32> -> vector<16x128xf32>
    %35 = vector.extract_strided_slice %8 {offsets = [0, 0, 32], sizes = [1, 16, 32], strides = [1, 1, 1]} : vector<1x16x384xf32> to vector<1x16x32xf32>
    %36 = arith.truncf %35 : vector<1x16x32xf32> to vector<1x16x32xbf16>
    %37 = vector.extract_strided_slice %8 {offsets = [0, 0, 160], sizes = [1, 16, 32], strides = [1, 1, 1]} : vector<1x16x384xf32> to vector<1x16x32xf32>
    %38 = arith.truncf %37 : vector<1x16x32xf32> to vector<1x16x32xbf16>
    %39 = vector.extract_strided_slice %8 {offsets = [0, 0, 288], sizes = [1, 16, 32], strides = [1, 1, 1]} : vector<1x16x384xf32> to vector<1x16x32xf32>
    %40 = arith.truncf %39 : vector<1x16x32xf32> to vector<1x16x32xbf16>
    "tpu.trace_start"() <{level = 10 : i32, message = "bqd,bkd->bqk"}> : () -> ()
    %cst_14 = arith.constant dense<0.000000e+00> : vector<1x16x16xf32>
    %41 = tpu.matmul %36, %38, %cst_14 {dimension_numbers = #tpu.dot_dimension_numbers<[2], [2], [1], [1], [0, 0, 0, 1, 1, 1], [0], [0]>} : vector<1x16x32xbf16>, vector<1x16x32xbf16>, vector<1x16x16xf32> -> vector<1x16x16xf32>
    "tpu.trace_stop"() : () -> ()
    %cst_15 = arith.constant 0.176776692 : f32
    %42 = vector.broadcast %cst_15 : f32 to vector<1x16x16xf32>
    %43 = arith.mulf %41, %42 : vector<1x16x16xf32>
    %cst_16 = arith.constant dense<0xFF800000> : vector<1x16xf32>
    %44 = vector.multi_reduction <maximumf>, %43, %cst_16 [2] : vector<1x16x16xf32> to vector<1x16xf32>
    %45 = vector.shape_cast %44 : vector<1x16xf32> to vector<1x16x1xf32>
    %46 = vector.broadcast %45 : vector<1x16x1xf32> to vector<1x16x16xf32>
    %47 = arith.subf %43, %46 : vector<1x16x16xf32>
    %48 = math.exp %47 : vector<1x16x16xf32>
    %cst_17 = arith.constant dense<0.000000e+00> : vector<1x16xf32>
    %49 = vector.multi_reduction <add>, %48, %cst_17 [2] : vector<1x16x16xf32> to vector<1x16xf32>
    %50 = vector.shape_cast %49 : vector<1x16xf32> to vector<1x16x1xf32>
    %51 = tpu.reciprocal %50 {approx = true} : vector<1x16x1xf32> -> vector<1x16x1xf32>
    %52 = vector.broadcast %51 : vector<1x16x1xf32> to vector<1x16x16xf32>
    %53 = arith.mulf %48, %52 : vector<1x16x16xf32>
    %54 = arith.truncf %53 : vector<1x16x16xf32> to vector<1x16x16xbf16>
    "tpu.trace_start"() <{level = 10 : i32, message = "bqk,bkd->bqd"}> : () -> ()
    %cst_18 = arith.constant dense<0.000000e+00> : vector<1x16x32xf32>
    %55 = tpu.matmul %54, %40, %cst_18 {dimension_numbers = #tpu.dot_dimension_numbers<[2], [1], [1], [2], [0, 0, 0, 1, 1, 2], [0], [0]>} : vector<1x16x16xbf16>, vector<1x16x32xbf16>, vector<1x16x32xf32> -> vector<1x16x32xf32>
    "tpu.trace_stop"() : () -> ()
    %56 = vector.shape_cast %55 : vector<1x16x32xf32> to vector<16x32xf32>
    %57 = arith.truncf %56 : vector<16x32xf32> to vector<16x32xbf16>
    %58 = vector.extract_strided_slice %9 {offsets = [32, 0], sizes = [32, 128], strides = [1, 1]} : vector<128x128xbf16> to vector<32x128xbf16>
    %cst_19 = arith.constant dense<0.000000e+00> : vector<16x128xf32>
    %59 = tpu.matmul %57, %58, %cst_19 {dimension_numbers = #tpu.dot_dimension_numbers<[1], [0], [0], [1], [0, 0, 1, 1], [], []>} : vector<16x32xbf16>, vector<32x128xbf16>, vector<16x128xf32> -> vector<16x128xf32>
    %60 = arith.addf %34, %59 : vector<16x128xf32>
    %61 = vector.extract_strided_slice %8 {offsets = [0, 0, 64], sizes = [1, 16, 32], strides = [1, 1, 1]} : vector<1x16x384xf32> to vector<1x16x32xf32>
    %62 = arith.truncf %61 : vector<1x16x32xf32> to vector<1x16x32xbf16>
    %63 = vector.extract_strided_slice %8 {offsets = [0, 0, 192], sizes = [1, 16, 32], strides = [1, 1, 1]} : vector<1x16x384xf32> to vector<1x16x32xf32>
    %64 = arith.truncf %63 : vector<1x16x32xf32> to vector<1x16x32xbf16>
    %65 = vector.extract_strided_slice %8 {offsets = [0, 0, 320], sizes = [1, 16, 32], strides = [1, 1, 1]} : vector<1x16x384xf32> to vector<1x16x32xf32>
    %66 = arith.truncf %65 : vector<1x16x32xf32> to vector<1x16x32xbf16>
    "tpu.trace_start"() <{level = 10 : i32, message = "bqd,bkd->bqk"}> : () -> ()
    %cst_20 = arith.constant dense<0.000000e+00> : vector<1x16x16xf32>
    %67 = tpu.matmul %62, %64, %cst_20 {dimension_numbers = #tpu.dot_dimension_numbers<[2], [2], [1], [1], [0, 0, 0, 1, 1, 1], [0], [0]>} : vector<1x16x32xbf16>, vector<1x16x32xbf16>, vector<1x16x16xf32> -> vector<1x16x16xf32>
    "tpu.trace_stop"() : () -> ()
    %cst_21 = arith.constant 0.176776692 : f32
    %68 = vector.broadcast %cst_21 : f32 to vector<1x16x16xf32>
    %69 = arith.mulf %67, %68 : vector<1x16x16xf32>
    %cst_22 = arith.constant dense<0xFF800000> : vector<1x16xf32>
    %70 = vector.multi_reduction <maximumf>, %69, %cst_22 [2] : vector<1x16x16xf32> to vector<1x16xf32>
    %71 = vector.shape_cast %70 : vector<1x16xf32> to vector<1x16x1xf32>
    %72 = vector.broadcast %71 : vector<1x16x1xf32> to vector<1x16x16xf32>
    %73 = arith.subf %69, %72 : vector<1x16x16xf32>
    %74 = math.exp %73 : vector<1x16x16xf32>
    %cst_23 = arith.constant dense<0.000000e+00> : vector<1x16xf32>
    %75 = vector.multi_reduction <add>, %74, %cst_23 [2] : vector<1x16x16xf32> to vector<1x16xf32>
    %76 = vector.shape_cast %75 : vector<1x16xf32> to vector<1x16x1xf32>
    %77 = tpu.reciprocal %76 {approx = true} : vector<1x16x1xf32> -> vector<1x16x1xf32>
    %78 = vector.broadcast %77 : vector<1x16x1xf32> to vector<1x16x16xf32>
    %79 = arith.mulf %74, %78 : vector<1x16x16xf32>
    %80 = arith.truncf %79 : vector<1x16x16xf32> to vector<1x16x16xbf16>
    "tpu.trace_start"() <{level = 10 : i32, message = "bqk,bkd->bqd"}> : () -> ()
    %cst_24 = arith.constant dense<0.000000e+00> : vector<1x16x32xf32>
    %81 = tpu.matmul %80, %66, %cst_24 {dimension_numbers = #tpu.dot_dimension_numbers<[2], [1], [1], [2], [0, 0, 0, 1, 1, 2], [0], [0]>} : vector<1x16x16xbf16>, vector<1x16x32xbf16>, vector<1x16x32xf32> -> vector<1x16x32xf32>
    "tpu.trace_stop"() : () -> ()
    %82 = vector.shape_cast %81 : vector<1x16x32xf32> to vector<16x32xf32>
    %83 = arith.truncf %82 : vector<16x32xf32> to vector<16x32xbf16>
    %84 = vector.extract_strided_slice %9 {offsets = [64, 0], sizes = [32, 128], strides = [1, 1]} : vector<128x128xbf16> to vector<32x128xbf16>
    %cst_25 = arith.constant dense<0.000000e+00> : vector<16x128xf32>
    %85 = tpu.matmul %83, %84, %cst_25 {dimension_numbers = #tpu.dot_dimension_numbers<[1], [0], [0], [1], [0, 0, 1, 1], [], []>} : vector<16x32xbf16>, vector<32x128xbf16>, vector<16x128xf32> -> vector<16x128xf32>
    %86 = arith.addf %60, %85 : vector<16x128xf32>
    %87 = vector.extract_strided_slice %8 {offsets = [0, 0, 96], sizes = [1, 16, 32], strides = [1, 1, 1]} : vector<1x16x384xf32> to vector<1x16x32xf32>
    %88 = arith.truncf %87 : vector<1x16x32xf32> to vector<1x16x32xbf16>
    %89 = vector.extract_strided_slice %8 {offsets = [0, 0, 224], sizes = [1, 16, 32], strides = [1, 1, 1]} : vector<1x16x384xf32> to vector<1x16x32xf32>
    %90 = arith.truncf %89 : vector<1x16x32xf32> to vector<1x16x32xbf16>
    %91 = vector.extract_strided_slice %8 {offsets = [0, 0, 352], sizes = [1, 16, 32], strides = [1, 1, 1]} : vector<1x16x384xf32> to vector<1x16x32xf32>
    %92 = arith.truncf %91 : vector<1x16x32xf32> to vector<1x16x32xbf16>
    "tpu.trace_start"() <{level = 10 : i32, message = "bqd,bkd->bqk"}> : () -> ()
    %cst_26 = arith.constant dense<0.000000e+00> : vector<1x16x16xf32>
    %93 = tpu.matmul %88, %90, %cst_26 {dimension_numbers = #tpu.dot_dimension_numbers<[2], [2], [1], [1], [0, 0, 0, 1, 1, 1], [0], [0]>} : vector<1x16x32xbf16>, vector<1x16x32xbf16>, vector<1x16x16xf32> -> vector<1x16x16xf32>
    "tpu.trace_stop"() : () -> ()
    %cst_27 = arith.constant 0.176776692 : f32
    %94 = vector.broadcast %cst_27 : f32 to vector<1x16x16xf32>
    %95 = arith.mulf %93, %94 : vector<1x16x16xf32>
    %cst_28 = arith.constant dense<0xFF800000> : vector<1x16xf32>
    %96 = vector.multi_reduction <maximumf>, %95, %cst_28 [2] : vector<1x16x16xf32> to vector<1x16xf32>
    %97 = vector.shape_cast %96 : vector<1x16xf32> to vector<1x16x1xf32>
    %98 = vector.broadcast %97 : vector<1x16x1xf32> to vector<1x16x16xf32>
    %99 = arith.subf %95, %98 : vector<1x16x16xf32>
    %100 = math.exp %99 : vector<1x16x16xf32>
    %cst_29 = arith.constant dense<0.000000e+00> : vector<1x16xf32>
    %101 = vector.multi_reduction <add>, %100, %cst_29 [2] : vector<1x16x16xf32> to vector<1x16xf32>
    %102 = vector.shape_cast %101 : vector<1x16xf32> to vector<1x16x1xf32>
    %103 = tpu.reciprocal %102 {approx = true} : vector<1x16x1xf32> -> vector<1x16x1xf32>
    %104 = vector.broadcast %103 : vector<1x16x1xf32> to vector<1x16x16xf32>
    %105 = arith.mulf %100, %104 : vector<1x16x16xf32>
    %106 = arith.truncf %105 : vector<1x16x16xf32> to vector<1x16x16xbf16>
    "tpu.trace_start"() <{level = 10 : i32, message = "bqk,bkd->bqd"}> : () -> ()
    %cst_30 = arith.constant dense<0.000000e+00> : vector<1x16x32xf32>
    %107 = tpu.matmul %106, %92, %cst_30 {dimension_numbers = #tpu.dot_dimension_numbers<[2], [1], [1], [2], [0, 0, 0, 1, 1, 2], [0], [0]>} : vector<1x16x16xbf16>, vector<1x16x32xbf16>, vector<1x16x32xf32> -> vector<1x16x32xf32>
    "tpu.trace_stop"() : () -> ()
    %108 = vector.shape_cast %107 : vector<1x16x32xf32> to vector<16x32xf32>
    %109 = arith.truncf %108 : vector<16x32xf32> to vector<16x32xbf16>
    %110 = vector.extract_strided_slice %9 {offsets = [96, 0], sizes = [32, 128], strides = [1, 1]} : vector<128x128xbf16> to vector<32x128xbf16>
    %cst_31 = arith.constant dense<0.000000e+00> : vector<16x128xf32>
    %111 = tpu.matmul %109, %110, %cst_31 {dimension_numbers = #tpu.dot_dimension_numbers<[1], [0], [0], [1], [0, 0, 1, 1], [], []>} : vector<16x32xbf16>, vector<32x128xbf16>, vector<16x128xf32> -> vector<16x128xf32>
    %112 = arith.addf %86, %111 : vector<16x128xf32>
    %c0_32 = arith.constant 0 : index
    %c0_33 = arith.constant 0 : index
    %113 = vector.load %arg5[%c0_32, %c0_33] : memref<1x128xf32, #tpu.memory_space<vmem>>, vector<1x128xf32>
    %114 = vector.broadcast %113 : vector<1x128xf32> to vector<16x128xf32>
    %115 = arith.addf %112, %114 : vector<16x128xf32>
    %116 = arith.addf %1, %115 : vector<16x128xf32>
    %cst_34 = arith.constant dense<0.000000e+00> : vector<16xf32>
    %117 = vector.multi_reduction <add>, %116, %cst_34 [1] : vector<16x128xf32> to vector<16xf32>
    %118 = vector.shape_cast %117 : vector<16xf32> to vector<16x1xf32>
    %cst_35 = arith.constant 1.280000e+02 : f32
    %119 = vector.broadcast %cst_35 : f32 to vector<16x1xf32>
    %120 = arith.divf %118, %119 : vector<16x1xf32>
    %121 = vector.broadcast %120 : vector<16x1xf32> to vector<16x128xf32>
    %122 = arith.subf %116, %121 : vector<16x128xf32>
    %123 = arith.mulf %122, %122 : vector<16x128xf32>
    %cst_36 = arith.constant dense<0.000000e+00> : vector<16xf32>
    %124 = vector.multi_reduction <add>, %123, %cst_36 [1] : vector<16x128xf32> to vector<16xf32>
    %125 = vector.shape_cast %124 : vector<16xf32> to vector<16x1xf32>
    %cst_37 = arith.constant 1.280000e+02 : f32
    %126 = vector.broadcast %cst_37 : f32 to vector<16x1xf32>
    %127 = arith.divf %125, %126 : vector<16x1xf32>
    %128 = vector.broadcast %120 : vector<16x1xf32> to vector<16x128xf32>
    %129 = arith.subf %116, %128 : vector<16x128xf32>
    %cst_38 = arith.constant 9.99999974E-6 : f32
    %130 = vector.broadcast %cst_38 : f32 to vector<16x1xf32>
    %131 = arith.addf %127, %130 : vector<16x1xf32>
    %132 = math.rsqrt %131 : vector<16x1xf32>
    %133 = vector.broadcast %132 : vector<16x1xf32> to vector<16x128xf32>
    %134 = arith.mulf %129, %133 : vector<16x128xf32>
    %c0_39 = arith.constant 0 : index
    %c0_40 = arith.constant 0 : index
    %135 = vector.load %arg6[%c0_39, %c0_40] : memref<1x128xf32, #tpu.memory_space<vmem>>, vector<1x128xf32>
    %136 = vector.broadcast %135 : vector<1x128xf32> to vector<16x128xf32>
    %137 = arith.mulf %134, %136 : vector<16x128xf32>
    %c0_41 = arith.constant 0 : index
    %c0_42 = arith.constant 0 : index
    %138 = vector.load %arg7[%c0_41, %c0_42] : memref<1x128xf32, #tpu.memory_space<vmem>>, vector<1x128xf32>
    %139 = vector.broadcast %138 : vector<1x128xf32> to vector<16x128xf32>
    %140 = arith.addf %137, %139 : vector<16x128xf32>
    %141 = arith.truncf %140 : vector<16x128xf32> to vector<16x128xbf16>
    %c0_43 = arith.constant 0 : index
    %c0_44 = arith.constant 0 : index
    %142 = vector.load %arg8[%c0_43, %c0_44] : memref<128x256xbf16, #tpu.memory_space<vmem>>, vector<128x256xbf16>
    %cst_45 = arith.constant dense<0.000000e+00> : vector<16x256xf32>
    %143 = tpu.matmul %141, %142, %cst_45 {dimension_numbers = #tpu.dot_dimension_numbers<[1], [0], [0], [1], [0, 0, 1, 1], [], []>} : vector<16x128xbf16>, vector<128x256xbf16>, vector<16x256xf32> -> vector<16x256xf32>
    %c0_46 = arith.constant 0 : index
    %c0_47 = arith.constant 0 : index
    %144 = vector.load %arg9[%c0_46, %c0_47] : memref<1x256xf32, #tpu.memory_space<vmem>>, vector<1x256xf32>
    %145 = vector.broadcast %144 : vector<1x256xf32> to vector<16x256xf32>
    %146 = arith.addf %143, %145 : vector<16x256xf32>
    %cst_48 = arith.constant 0.000000e+00 : f32
    %147 = vector.broadcast %cst_48 : f32 to vector<16x256xf32>
    %148 = arith.maximumf %146, %147 : vector<16x256xf32>
    %149 = arith.truncf %148 : vector<16x256xf32> to vector<16x256xbf16>
    %c0_49 = arith.constant 0 : index
    %c0_50 = arith.constant 0 : index
    %150 = vector.load %arg10[%c0_49, %c0_50] : memref<256x128xbf16, #tpu.memory_space<vmem>>, vector<256x128xbf16>
    %cst_51 = arith.constant dense<0.000000e+00> : vector<16x128xf32>
    %151 = tpu.matmul %149, %150, %cst_51 {dimension_numbers = #tpu.dot_dimension_numbers<[1], [0], [0], [1], [0, 0, 1, 1], [], []>} : vector<16x256xbf16>, vector<256x128xbf16>, vector<16x128xf32> -> vector<16x128xf32>
    %c0_52 = arith.constant 0 : index
    %c0_53 = arith.constant 0 : index
    %152 = vector.load %arg11[%c0_52, %c0_53] : memref<1x128xf32, #tpu.memory_space<vmem>>, vector<1x128xf32>
    %153 = vector.broadcast %152 : vector<1x128xf32> to vector<16x128xf32>
    %154 = arith.addf %151, %153 : vector<16x128xf32>
    %155 = arith.addf %140, %154 : vector<16x128xf32>
    %cst_54 = arith.constant dense<0.000000e+00> : vector<16xf32>
    %156 = vector.multi_reduction <add>, %155, %cst_54 [1] : vector<16x128xf32> to vector<16xf32>
    %157 = vector.shape_cast %156 : vector<16xf32> to vector<16x1xf32>
    %cst_55 = arith.constant 1.280000e+02 : f32
    %158 = vector.broadcast %cst_55 : f32 to vector<16x1xf32>
    %159 = arith.divf %157, %158 : vector<16x1xf32>
    %160 = vector.broadcast %159 : vector<16x1xf32> to vector<16x128xf32>
    %161 = arith.subf %155, %160 : vector<16x128xf32>
    %162 = arith.mulf %161, %161 : vector<16x128xf32>
    %cst_56 = arith.constant dense<0.000000e+00> : vector<16xf32>
    %163 = vector.multi_reduction <add>, %162, %cst_56 [1] : vector<16x128xf32> to vector<16xf32>
    %164 = vector.shape_cast %163 : vector<16xf32> to vector<16x1xf32>
    %cst_57 = arith.constant 1.280000e+02 : f32
    %165 = vector.broadcast %cst_57 : f32 to vector<16x1xf32>
    %166 = arith.divf %164, %165 : vector<16x1xf32>
    %167 = vector.broadcast %159 : vector<16x1xf32> to vector<16x128xf32>
    %168 = arith.subf %155, %167 : vector<16x128xf32>
    %cst_58 = arith.constant 9.99999974E-6 : f32
    %169 = vector.broadcast %cst_58 : f32 to vector<16x1xf32>
    %170 = arith.addf %166, %169 : vector<16x1xf32>
    %171 = math.rsqrt %170 : vector<16x1xf32>
    %172 = vector.broadcast %171 : vector<16x1xf32> to vector<16x128xf32>
    %173 = arith.mulf %168, %172 : vector<16x128xf32>
    %c0_59 = arith.constant 0 : index
    %c0_60 = arith.constant 0 : index
    %174 = vector.load %arg12[%c0_59, %c0_60] : memref<1x128xf32, #tpu.memory_space<vmem>>, vector<1x128xf32>
    %175 = vector.broadcast %174 : vector<1x128xf32> to vector<16x128xf32>
    %176 = arith.mulf %173, %175 : vector<16x128xf32>
    %c0_61 = arith.constant 0 : index
    %c0_62 = arith.constant 0 : index
    %177 = vector.load %arg13[%c0_61, %c0_62] : memref<1x128xf32, #tpu.memory_space<vmem>>, vector<1x128xf32>
    %178 = vector.broadcast %177 : vector<1x128xf32> to vector<16x128xf32>
    %179 = arith.addf %176, %178 : vector<16x128xf32>
    %180 = vector.shape_cast %179 : vector<16x128xf32> to vector<1x16x128xf32>
    %c0_63 = arith.constant 0 : index
    %c0_64 = arith.constant 0 : index
    %c0_65 = arith.constant 0 : index
    %181 = vector.load %arg14[%c0_63, %c0_64, %c0_65] : memref<1x16x128xf32, #tpu.memory_space<vmem>>, vector<1x16x128xf32>
    tpu.vector_store %arg14[%c0_63, %c0_64, %c0_65], %180 {strides = array<i32>} : memref<1x16x128xf32, #tpu.memory_space<vmem>>, vector<1x16x128xf32>,
    return
  }
  func.func @transform_0(%arg0: i32) -> (i32, i32, i32) {
    %c0_i32 = arith.constant 0 : i32
    %c0_i32_0 = arith.constant 0 : i32
    %c0_i32_1 = arith.constant 0 : i32
    return %arg0, %c0_i32, %c0_i32_0 : i32, i32, i32
  }
  func.func @transform_1(%arg0: i32) -> (i32, i32) {
    %c0_i32 = arith.constant 0 : i32
    %c0_i32_0 = arith.constant 0 : i32
    %c0_i32_1 = arith.constant 0 : i32
    return %c0_i32, %c0_i32_0 : i32, i32
  }
  func.func @transform_2(%arg0: i32) -> (i32, i32) {
    %c0_i32 = arith.constant 0 : i32
    %c0_i32_0 = arith.constant 0 : i32
    %c0_i32_1 = arith.constant 0 : i32
    return %c0_i32, %c0_i32_0 : i32, i32
  }
  func.func @transform_3(%arg0: i32) -> (i32, i32) {
    %c0_i32 = arith.constant 0 : i32
    %c0_i32_0 = arith.constant 0 : i32
    %c0_i32_1 = arith.constant 0 : i32
    return %c0_i32, %c0_i32_0 : i32, i32
  }
  func.func @transform_4(%arg0: i32) -> (i32, i32) {
    %c0_i32 = arith.constant 0 : i32
    %c0_i32_0 = arith.constant 0 : i32
    %c0_i32_1 = arith.constant 0 : i32
    return %c0_i32, %c0_i32_0 : i32, i32
  }
  func.func @transform_5(%arg0: i32) -> (i32, i32) {
    %c0_i32 = arith.constant 0 : i32
    %c0_i32_0 = arith.constant 0 : i32
    %c0_i32_1 = arith.constant 0 : i32
    return %c0_i32, %c0_i32_0 : i32, i32
  }
  func.func @transform_6(%arg0: i32) -> (i32, i32) {
    %c0_i32 = arith.constant 0 : i32
    %c0_i32_0 = arith.constant 0 : i32
    %c0_i32_1 = arith.constant 0 : i32
    return %c0_i32, %c0_i32_0 : i32, i32
  }
  func.func @transform_7(%arg0: i32) -> (i32, i32) {
    %c0_i32 = arith.constant 0 : i32
    %c0_i32_0 = arith.constant 0 : i32
    %c0_i32_1 = arith.constant 0 : i32
    return %c0_i32, %c0_i32_0 : i32, i32
  }
  func.func @transform_8(%arg0: i32) -> (i32, i32) {
    %c0_i32 = arith.constant 0 : i32
    %c0_i32_0 = arith.constant 0 : i32
    %c0_i32_1 = arith.constant 0 : i32
    return %c0_i32, %c0_i32_0 : i32, i32
  }
  func.func @transform_9(%arg0: i32) -> (i32, i32) {
    %c0_i32 = arith.constant 0 : i32
    %c0_i32_0 = arith.constant 0 : i32
    %c0_i32_1 = arith.constant 0 : i32
    return %c0_i32, %c0_i32_0 : i32, i32
  }
  func.func @transform_10(%arg0: i32) -> (i32, i32) {
    %c0_i32 = arith.constant 0 : i32
    %c0_i32_0 = arith.constant 0 : i32
    %c0_i32_1 = arith.constant 0 : i32
    return %c0_i32, %c0_i32_0 : i32, i32
  }
  func.func @transform_11(%arg0: i32) -> (i32, i32) {
    %c0_i32 = arith.constant 0 : i32
    %c0_i32_0 = arith.constant 0 : i32
    %c0_i32_1 = arith.constant 0 : i32
    return %c0_i32, %c0_i32_0 : i32, i32
  }
  func.func @transform_12(%arg0: i32) -> (i32, i32) {
    %c0_i32 = arith.constant 0 : i32
    %c0_i32_0 = arith.constant 0 : i32
    %c0_i32_1 = arith.constant 0 : i32
    return %c0_i32, %c0_i32_0 : i32, i32
  }
  func.func @transform_13(%arg0: i32) -> (i32, i32, i32) {
    %c0_i32 = arith.constant 0 : i32
    %c0_i32_0 = arith.constant 0 : i32
    %c0_i32_1 = arith.constant 0 : i32
    return %arg0, %c0_i32, %c0_i32_0 : i32, i32, i32
  }
}

</mosaic_0001>

<bundles_post_ra>
// kernel: tpu_custom_call.1
= control target key start
LH: loop header
LB: loop body
LE: loop exit
PB: predicated region body
PF: predicated region fallthrough
CT: control target
= control target key end

     0   :  { %s4036_s0 = inlined_call_operand.hbm [shape: f32[2,16,128], index: 0, kind: input, shape index: {}]   ;;  %s4037_s1 = inlined_call_operand.hbm [shape: bf16[128,384], index: 1, kind: input, shape index: {}]   ;;  %s4038_s2 = inlined_call_operand.hbm [shape: f32[1,384], index: 2, kind: input, shape index: {}]   ;;  %s4039_s3 = inlined_call_operand.hbm [shape: bf16[128,128], index: 3, kind: input, shape index: {}]   ;;  %s4040_s4 = inlined_call_operand.hbm [shape: f32[1,128], index: 4, kind: input, shape index: {}]   ;;  %s4041_s5 = inlined_call_operand.hbm [shape: f32[1,128], index: 5, kind: input, shape index: {}]   ;;  %s4042_s6 = inlined_call_operand.hbm [shape: f32[1,128], index: 6, kind: input, shape index: {}]   ;;  %s4043_s7 = inlined_call_operand.hbm [shape: bf16[128,256], index: 7, kind: input, shape index: {}]   ;;  %s4044_s8 = inlined_call_operand.hbm [shape: f32[1,256], index: 8, kind: input, shape index: {}]   ;;  %s4045_s9 = inlined_call_operand.hbm [shape: bf16[256,128], index: 9, kind: input, shape index: {}]   ;;  %s4046_s10 = inlined_call_operand.hbm [shape: f32[1,128], index: 10, kind: input, shape index: {}]   ;;  %s4047_s11 = inlined_call_operand.hbm [shape: f32[1,128], index: 11, kind: input, shape index: {}]   ;;  %s4048_s12 = inlined_call_operand.hbm [shape: f32[1,128], index: 12, kind: input, shape index: {}]   ;;  %s4049_s13 = inlined_call_operand.hbm [shape: f32[2,16,128], index: 13, kind: output, shape index: {}]  }
   0x1   :  { %4063 = sst [smem:[#allocation35_spill]] %s4036_s0 }
   0x2   :  { %4064 = sst [smem:[#allocation36_spill]] %s4037_s1 }
   0x3   :  { %4065 = sst [smem:[#allocation37_spill]] %s4038_s2 }
   0x4   :  { %4066 = sst [smem:[#allocation38_spill]] %s4049_s13 }
   0x5   :  { %18 = vsyncpa [#allocation3], 0 }
   0x6   :  { %20 = vsyncpa [#allocation3 + $0x1], 0 }
   0x7   :  { %21 = vsyncpa [#allocation6], 0 }
   0x8   :  { %22 = vsyncpa [#allocation9], 0 }
   0x9   :  { %23 = vsyncpa [#allocation12], 0 }
   0xa   :  { %24 = vsyncpa [#allocation15], 0 }
   0xb   :  { %25 = vsyncpa [#allocation18], 0 }
   0xc   :  { %26 = vsyncpa [#allocation21], 0 }
   0xd   :  { %27 = vsyncpa [#allocation4], 0 }
   0xe   :  { %29 = vsyncpa [#allocation4 + $0x1], 0  ;;  %s3392_s25 = smov 0   ;;  %s3394_s26 = smov 0  }
   0xf   :  { %s3396_s27 = smov 0   ;;  %s3398_s28 = smov 0  }
  0x10 LB: > { %4067 = sst [smem:[#allocation32_spill]] %s3280_s25  ;;  %s3294_s29 = smov [#allocation5]   ;;  %s3292_s28 = sphi %s3398_s28, %s4111_s28   ;;  %s3288_s27 = sphi %s3396_s27, %s4110_s27   ;;  %s3284_s26 = sphi %s3394_s26, %s4109_s26   ;;  %s3280_s25 = sphi %s3392_s25, %s4108_s25  }
  0x11   : > { %s356_s30 = sshll.u32 %s3294_s29, 4  ;;  %s3413_s14 = sadd.s32 4294967295, %s3292_s28   ;;  %s3418_s30 = int_to_ptr.vmem [resolvable:$true] %s356_s30 }
  0x12   : > { %4068 = sst [smem:[#allocation33_spill]] %s3413_s14  ;;  %p2255_p0 = scmp.ge.s32.totalorder %s3292_s28, 1 }
  0x13   : > { %p4056_p1 = scmp.eq.s32.totalorder %s3413_s14, 0  ;;  %p344_p2 = scmp.lt.s32.totalorder %s3292_s28, 3 }
  0x14   : > { %s3295_s16 = smov [#allocation8]   ;;  %s3296_s19 = smov [#allocation11]  }
  0x15   : > { %p3420_p3 = pnand %p2255_p0, %p344_p2  ;;  %s380_s17 = sshll.u32 %s3295_s16, 4  ;;  %s3433_s17 = int_to_ptr.vmem [resolvable:$true] %s380_s17 }
  0x16   : > { %s3435_s20 = sshll.u32 %s3296_s19, 4  ;;  %s4072_s1 = sld [smem:[#allocation36_spill]]  ;;  %s406_s20 = int_to_ptr.vmem [resolvable:$true] %s3435_s20 }
  0x17   : > { %s4069_s15 = scalar_select %p3420_p3, 1, 0 }
  0x18   : > { %p2587_p5 = pneg %p3420_p3 }
  0x19   : > { %4070 = sst [smem:[#allocation34_spill]] %s4069_s15 }
  0x1a   : > { %p3429_p6 = pnand %p2587_p5, %p4056_p1 }
  0x1c   : > { %s2836_s23 = scalar_lea.hbm %s4072_s1, 3072  ;;  %p3445_p8 = pneg %p3429_p6 }
  0x1d   : > { %p2837_p7 = scmp.ne.s32.totalorder %s4072_s1, %s2836_s23  ;;  %p2843_p11 = scmp.lt.u32.totalorder %s2836_s23, %s4072_s1 }
  0x1f   : > { %p2839_p9 = pnand %p3445_p8, %p2837_p7 }
  0x21   : > { %p2840_p10 = pneg %p2839_p9 }
  0x23   : > { %p2845_p12 = pnand %p2843_p11, %p2840_p10 }
  0x25   : > { %2848 = shalt.err (!%p2845_p12)
}
  0x26   : > { %s2849_s21 = scalar_lea.vmem %s3418_s30, 3072  ;;  %p2857_p5 = scmp.lt.s32.totalorder %s3418_s30, %s3418_s30 }
  0x27   : > { %p2850_p13 = scmp.ne.s32.totalorder %s3418_s30, %s2849_s21  ;;  %p2858_p4 = scmp.lt.s32.totalorder %s2849_s21, %s2849_s21 }
  0x29   : > { %p2852_p0 = pnand %p2850_p13, %p3445_p8  ;;  %p2859_p7 = por %p2858_p4, %p2857_p5 }
  0x2b   : > { %p2853_p2 = pneg %p2852_p0 }
  0x2d   : > { %p2860_p9 = pnand %p2859_p7, %p2853_p2 }
  0x2f   : > { %2863 = shalt.err (!%p2860_p9)
}
  0x30   : > { %s3297_s22 = smov 192   ;;  %s3298_s13 = smov 12  }
  0x31   : > { %2590 = dma.hbm_to_vmem [thread:$0]  (!%p3429_p6), %s4072_s1, 3072, %s3418_s30, [#allocation6], %s3297_s22, %s3297_s22, %s3298_s13  }
  0x32   : > { %s2864_s15 = scalar_lea.hbm %s4039_s3, 1024 }
  0x33   : > { %p2865_p4 = scmp.ne.s32.totalorder %s4039_s3, %s2864_s15  ;;  %p2871_p12 = scmp.lt.u32.totalorder %s2864_s15, %s4039_s3 }
  0x35   : > { %p2867_p10 = pnand %p2865_p4, %p3445_p8 }
  0x37   : > { %p2868_p11 = pneg %p2867_p10 }
  0x39   : > { %p2873_p13 = pnand %p2871_p12, %p2868_p11 }
  0x3b   : > { %2876 = shalt.err (!%p2873_p13)
}
  0x3c   : > { %s2877_s30 = scalar_lea.vmem %s3433_s17, 1024  ;;  %p2885_p7 = scmp.lt.s32.totalorder %s3433_s17, %s3433_s17 }
  0x3d   : > { %p2878_p0 = scmp.ne.s32.totalorder %s3433_s17, %s2877_s30  ;;  %p2886_p9 = scmp.lt.s32.totalorder %s2877_s30, %s2877_s30 }
  0x3f   : > { %p2880_p2 = pnand %p2878_p0, %p3445_p8  ;;  %p2887_p4 = por %p2886_p9, %p2885_p7 }
  0x41   : > { %p2881_p5 = pneg %p2880_p2 }
  0x43   : > { %p2888_p10 = pnand %p2887_p4, %p2881_p5 }
  0x45   : > { %2891 = shalt.err (!%p2888_p10)
}
  0x46   : > { %s4058_s0 = smov 64   ;;  %s4059_s25 = smov 4  }
  0x47   : > { %2596 = dma.hbm_to_vmem [thread:$0]  (!%p3429_p6), %s4039_s3, 1024, %s3433_s17, [#allocation9], %s4058_s0, %s4058_s0, %s4059_s25  }
  0x48   : > { %s2892_s23 = scalar_lea.hbm %s4041_s5, 16 }
  0x49   : > { %p2893_p11 = scmp.ne.s32.totalorder %s4041_s5, %s2892_s23  ;;  %p2899_p0 = scmp.lt.u32.totalorder %s2892_s23, %s4041_s5 }
  0x4b   : > { %p2895_p12 = pnand %p2893_p11, %p3445_p8 }
  0x4d   : > { %p2896_p13 = pneg %p2895_p12 }
  0x4f   : > { %p2901_p2 = pnand %p2899_p0, %p2896_p13 }
  0x51   : > { %2904 = shalt.err (!%p2901_p2)
}
  0x52   : > { %s2905_s30 = scalar_lea.vmem %s406_s20, 16  ;;  %s2912_s17 = scalar_lea.vmem %s406_s20, 32 }
  0x53   : > { %p2906_p5 = scmp.ne.s32.totalorder %s406_s20, %s2905_s30  ;;  %p2913_p4 = scmp.lt.s32.totalorder %s406_s20, %s406_s20 }
  0x54   : > { %p2914_p10 = scmp.lt.s32.totalorder %s2912_s17, %s2905_s30 }
  0x55   : > { %p2908_p7 = pnand %p2906_p5, %p3445_p8 }
  0x56   : > { %p2915_p1 = por %p2914_p10, %p2913_p4 }
  0x57   : > { %p2909_p9 = pneg %p2908_p7 }
  0x59   : > { %p2916_p3 = pnand %p2915_p1, %p2909_p9 }
  0x5b   : > { %2919 = shalt.err (!%p2916_p3)
}
  0x5c   : > { %2602 = dma.hbm_to_vmem [thread:$0]  (!%p3429_p6), %s4041_s5, 16, %s406_s20, [#allocation12]  }
  0x5d   : > { %s3301_s22 = smov [#allocation14]   ;;  %s2920_s29 = scalar_lea.hbm %s4043_s7, 2048 }
  0x5e   : > { %s426_s13 = sshll.u32 %s3301_s22, 4  ;;  %p2921_p11 = scmp.ne.s32.totalorder %s4043_s7, %s2920_s29  ;;  %s427_s13 = int_to_ptr.vmem [resolvable:$true] %s426_s13 }
  0x5f   : > { %p2927_p12 = scmp.lt.u32.totalorder %s2920_s29, %s4043_s7 }
  0x60   : > { %p2923_p1 = pnand %p2921_p11, %p3445_p8 }
  0x62   : > { %p2924_p3 = pneg %p2923_p1 }
  0x64   : > { %p2929_p13 = pnand %p2927_p12, %p2924_p3 }
  0x66   : > { %2932 = shalt.err (!%p2929_p13)
}
  0x67   : > { %s2933_s20 = scalar_lea.vmem %s427_s13, 2048  ;;  %p2941_p7 = scmp.lt.s32.totalorder %s427_s13, %s427_s13 }
  0x68   : > { %p2934_p0 = scmp.ne.s32.totalorder %s427_s13, %s2933_s20  ;;  %p2942_p9 = scmp.lt.s32.totalorder %s2933_s20, %s2933_s20 }
  0x6a   : > { %p2936_p2 = pnand %p2934_p0, %p3445_p8  ;;  %p2943_p4 = por %p2942_p9, %p2941_p7 }
  0x6c   : > { %p2937_p5 = pneg %p2936_p2 }
  0x6e   : > { %p2944_p10 = pnand %p2943_p4, %p2937_p5 }
  0x70   : > { %2947 = shalt.err (!%p2944_p10)
}
  0x71   : > { %s4060_s14 = smov 128   ;;  %s4061_s15 = smov 8  }
  0x72   : > { %2608 = dma.hbm_to_vmem [thread:$0]  (!%p3429_p6), %s4043_s7, 2048, %s427_s13, [#allocation15], %s4060_s14, %s4060_s14, %s4061_s15  }
  0x73   : > { %s3304_s24 = smov [#allocation17]   ;;  %s3305_s19 = smov [#allocation20]  }
  0x74   : > { %s450_s29 = sshll.u32 %s3304_s24, 4  ;;  %s475_s21 = sshll.u32 %s3305_s19, 4  ;;  %s451_s29 = int_to_ptr.vmem [resolvable:$true] %s450_s29  ;;  %s3532_s21 = int_to_ptr.vmem [resolvable:$true] %s475_s21 }
  0x75   : > { %s2948_s20 = scalar_lea.hbm %s4045_s9, 2048 }
  0x76   : > { %p2949_p11 = scmp.ne.s32.totalorder %s4045_s9, %s2948_s20  ;;  %p2955_p12 = scmp.lt.u32.totalorder %s2948_s20, %s4045_s9 }
  0x78   : > { %p2951_p1 = pnand %p2949_p11, %p3445_p8 }
  0x7a   : > { %p2952_p3 = pneg %p2951_p1 }
  0x7c   : > { %p2957_p13 = pnand %p2955_p12, %p2952_p3 }
  0x7e   : > { %2960 = shalt.err (!%p2957_p13)
}
  0x7f   : > { %s2961_s23 = scalar_lea.vmem %s451_s29, 2048  ;;  %p2969_p7 = scmp.lt.s32.totalorder %s451_s29, %s451_s29 }
  0x80   : > { %p2962_p0 = scmp.ne.s32.totalorder %s451_s29, %s2961_s23  ;;  %p2970_p9 = scmp.lt.s32.totalorder %s2961_s23, %s2961_s23 }
  0x82   : > { %p2964_p2 = pnand %p2962_p0, %p3445_p8  ;;  %p2971_p4 = por %p2970_p9, %p2969_p7 }
  0x84   : > { %p2965_p5 = pneg %p2964_p2 }
  0x86   : > { %p2972_p10 = pnand %p2971_p4, %p2965_p5 }
  0x88   : > { %2975 = shalt.err (!%p2972_p10)
}
  0x89   : > { %s4074_s0 = smov 4   ;;  %s4075_s25 = smov 64  }
  0x8a   : > { %2614 = dma.hbm_to_vmem [thread:$0]  (!%p3429_p6), %s4045_s9, 2048, %s451_s29, [#allocation18], %s4075_s25, %s4075_s25, %s4074_s0  }
  0x8b   : > { %s2976_s20 = scalar_lea.hbm %s4047_s11, 16 }
  0x8c   : > { %p2977_p11 = scmp.ne.s32.totalorder %s4047_s11, %s2976_s20  ;;  %p2983_p12 = scmp.lt.u32.totalorder %s2976_s20, %s4047_s11 }
  0x8e   : > { %p2979_p1 = pnand %p2977_p11, %p3445_p8 }
  0x90   : > { %p2980_p3 = pneg %p2979_p1 }
  0x92   : > { %p2985_p13 = pnand %p2983_p12, %p2980_p3 }
  0x94   : > { %2988 = shalt.err (!%p2985_p13)
}
  0x95   : > { %s2989_s29 = scalar_lea.vmem %s3532_s21, 16  ;;  %s2996_s0 = scalar_lea.vmem %s3532_s21, 32 }
  0x96   : > { %p2990_p0 = scmp.ne.s32.totalorder %s3532_s21, %s2989_s29  ;;  %p2997_p7 = scmp.lt.s32.totalorder %s3532_s21, %s3532_s21 }
  0x97   : > { %p2998_p9 = scmp.lt.s32.totalorder %s2996_s0, %s2989_s29 }
  0x98   : > { %p2992_p2 = pnand %p2990_p0, %p3445_p8 }
  0x99   : > { %p2999_p4 = por %p2998_p9, %p2997_p7 }
  0x9a   : > { %p2993_p5 = pneg %p2992_p2 }
  0x9c   : > { %p3000_p10 = pnand %p2999_p4, %p2993_p5 }
  0x9e   : > { %3003 = shalt.err (!%p3000_p10)
}
  0x9f   : > { %2620 = dma.hbm_to_vmem [thread:$0]  (!%p3429_p6), %s4047_s11, 16, %s3532_s21, [#allocation21]  }
  0xa0   : > { %s3306_s24 = smov [#allocation7]   ;;  %s3307_s30 = smov [#allocation10]  }
  0xa1   : > { %s370_s19 = sshll.u32 %s3306_s24, 4  ;;  %s394_s17 = sshll.u32 %s3307_s30, 4  ;;  %s371_s19 = int_to_ptr.vmem [resolvable:$true] %s370_s19  ;;  %s3579_s17 = int_to_ptr.vmem [resolvable:$true] %s394_s17 }
  0xa2   : > { %s4076_s2 = sld [smem:[#allocation37_spill]] }
  0xa8   : > { %s3004_s13 = scalar_lea.hbm %s4076_s2, 48 }
  0xa9   : > { %p3005_p11 = scmp.ne.s32.totalorder %s4076_s2, %s3004_s13  ;;  %p3011_p12 = scmp.lt.u32.totalorder %s3004_s13, %s4076_s2 }
  0xab   : > { %p3007_p1 = pnand %p3005_p11, %p3445_p8 }
  0xad   : > { %p3008_p3 = pneg %p3007_p1 }
  0xaf   : > { %p3013_p13 = pnand %p3011_p12, %p3008_p3 }
  0xb1   : > { %3016 = shalt.err (!%p3013_p13)
}
  0xb2   : > { %s3017_s14 = scalar_lea.vmem %s371_s19, 48  ;;  %s3024_s25 = scalar_lea.vmem %s371_s19, 64 }
  0xb3   : > { %p3018_p0 = scmp.ne.s32.totalorder %s371_s19, %s3017_s14  ;;  %p3025_p7 = scmp.lt.s32.totalorder %s371_s19, %s371_s19 }
  0xb4   : > { %p3026_p9 = scmp.lt.s32.totalorder %s3024_s25, %s3017_s14 }
  0xb5   : > { %p3020_p2 = pnand %p3018_p0, %p3445_p8 }
  0xb6   : > { %p3027_p4 = por %p3026_p9, %p3025_p7 }
  0xb7   : > { %p3021_p5 = pneg %p3020_p2 }
  0xb9   : > { %p3028_p10 = pnand %p3027_p4, %p3021_p5 }
  0xbb   : > { %3031 = shalt.err (!%p3028_p10)
}
  0xbc   : > { %2593 = dma.hbm_to_vmem [thread:$0]  (!%p3429_p6), %s4076_s2, 48, %s371_s19, [#allocation6]  }
  0xbd   : > { %s3032_s13 = scalar_lea.hbm %s4040_s4, 16 }
  0xbe   : > { %p3033_p11 = scmp.ne.s32.totalorder %s4040_s4, %s3032_s13  ;;  %p3039_p12 = scmp.lt.u32.totalorder %s3032_s13, %s4040_s4 }
  0xc0   : > { %p3035_p1 = pnand %p3033_p11, %p3445_p8 }
  0xc2   : > { %p3036_p3 = pneg %p3035_p1 }
  0xc4   : > { %p3041_p13 = pnand %p3039_p12, %p3036_p3 }
  0xc6   : > { %3044 = shalt.err (!%p3041_p13)
}
  0xc7   : > { %s3045_s19 = scalar_lea.vmem %s3579_s17, 16  ;;  %s3052_s14 = scalar_lea.vmem %s3579_s17, 32 }
  0xc8   : > { %p3046_p0 = scmp.ne.s32.totalorder %s3579_s17, %s3045_s19  ;;  %p3053_p7 = scmp.lt.s32.totalorder %s3579_s17, %s3579_s17 }
  0xc9   : > { %p3054_p9 = scmp.lt.s32.totalorder %s3052_s14, %s3045_s19 }
  0xca   : > { %p3048_p2 = pnand %p3046_p0, %p3445_p8 }
  0xcb   : > { %p3055_p4 = por %p3054_p9, %p3053_p7 }
  0xcc   : > { %p3049_p5 = pneg %p3048_p2 }
  0xce   : > { %p3056_p10 = pnand %p3055_p4, %p3049_p5 }
  0xd0   : > { %3059 = shalt.err (!%p3056_p10)
}
  0xd1   : > { %2599 = dma.hbm_to_vmem [thread:$0]  (!%p3429_p6), %s4040_s4, 16, %s3579_s17, [#allocation9]  }
  0xd2   : > { %s3308_s30 = smov [#allocation13]   ;;  %s3309_s22 = smov [#allocation16]  }
  0xd3   : > { %s416_s20 = sshll.u32 %s3308_s30, 4  ;;  %s440_s13 = sshll.u32 %s3309_s22, 4  ;;  %s417_s20 = int_to_ptr.vmem [resolvable:$true] %s416_s20  ;;  %s3623_s13 = int_to_ptr.vmem [resolvable:$true] %s440_s13 }
  0xd4   : > { %s3060_s0 = scalar_lea.hbm %s4042_s6, 16 }
  0xd5   : > { %p3061_p11 = scmp.ne.s32.totalorder %s4042_s6, %s3060_s0  ;;  %p3067_p12 = scmp.lt.u32.totalorder %s3060_s0, %s4042_s6 }
  0xd7   : > { %p3063_p1 = pnand %p3061_p11, %p3445_p8 }
  0xd9   : > { %p3064_p3 = pneg %p3063_p1 }
  0xdb   : > { %p3069_p13 = pnand %p3067_p12, %p3064_p3 }
  0xdd   : > { %3072 = shalt.err (!%p3069_p13)
}
  0xde   : > { %s3073_s25 = scalar_lea.vmem %s417_s20, 16  ;;  %s3080_s24 = scalar_lea.vmem %s417_s20, 32 }
  0xdf   : > { %p3074_p0 = scmp.ne.s32.totalorder %s417_s20, %s3073_s25  ;;  %p3081_p7 = scmp.lt.s32.totalorder %s417_s20, %s417_s20 }
  0xe0   : > { %p3082_p9 = scmp.lt.s32.totalorder %s3080_s24, %s3073_s25 }
  0xe1   : > { %p3076_p2 = pnand %p3074_p0, %p3445_p8 }
  0xe2   : > { %p3083_p4 = por %p3082_p9, %p3081_p7 }
  0xe3   : > { %p3077_p5 = pneg %p3076_p2 }
  0xe5   : > { %p3084_p10 = pnand %p3083_p4, %p3077_p5 }
  0xe7   : > { %3087 = shalt.err (!%p3084_p10)
}
  0xe8   : > { %2605 = dma.hbm_to_vmem [thread:$0]  (!%p3429_p6), %s4042_s6, 16, %s417_s20, [#allocation12]  }
  0xe9   : > { %s3088_s0 = scalar_lea.hbm %s4044_s8, 32 }
  0xea   : > { %p3089_p11 = scmp.ne.s32.totalorder %s4044_s8, %s3088_s0  ;;  %p3095_p12 = scmp.lt.u32.totalorder %s3088_s0, %s4044_s8 }
  0xec   : > { %p3091_p1 = pnand %p3089_p11, %p3445_p8 }
  0xee   : > { %p3092_p3 = pneg %p3091_p1 }
  0xf0   : > { %p3097_p13 = pnand %p3095_p12, %p3092_p3 }
  0xf2   : > { %3100 = shalt.err (!%p3097_p13)
}
  0xf3   : > { %s3101_s20 = scalar_lea.vmem %s3623_s13, 32  ;;  %p3109_p7 = scmp.lt.s32.totalorder %s3623_s13, %s3623_s13 }
  0xf4   : > { %p3102_p0 = scmp.ne.s32.totalorder %s3623_s13, %s3101_s20  ;;  %p3110_p9 = scmp.lt.s32.totalorder %s3101_s20, %s3101_s20 }
  0xf6   : > { %p3104_p2 = pnand %p3102_p0, %p3445_p8  ;;  %p3111_p4 = por %p3110_p9, %p3109_p7 }
  0xf8   : > { %p3105_p5 = pneg %p3104_p2 }
  0xfa   : > { %p3112_p10 = pnand %p3111_p4, %p3105_p5 }
  0xfc   : > { %3115 = shalt.err (!%p3112_p10)
}
  0xfd   : > { %2611 = dma.hbm_to_vmem [thread:$0]  (!%p3429_p6), %s4044_s8, 32, %s3623_s13, [#allocation15]  }
  0xfe   : > { %s3310_s30 = smov [#allocation19]   ;;  %s3311_s23 = smov [#allocation22]  }
  0xff   : > { %s464_s22 = sshll.u32 %s3310_s30, 4  ;;  %s486_s29 = sshll.u32 %s3311_s23, 4  ;;  %s465_s22 = int_to_ptr.vmem [resolvable:$true] %s464_s22  ;;  %s3666_s29 = int_to_ptr.vmem [resolvable:$true] %s486_s29 }
 0x100   : > { %s3116_s19 = scalar_lea.hbm %s4046_s10, 16 }
 0x101   : > { %p3117_p11 = scmp.ne.s32.totalorder %s4046_s10, %s3116_s19  ;;  %p3123_p12 = scmp.lt.u32.totalorder %s3116_s19, %s4046_s10 }
 0x103   : > { %p3119_p1 = pnand %p3117_p11, %p3445_p8 }
 0x105   : > { %p3120_p3 = pneg %p3119_p1 }
 0x107   : > { %p3125_p13 = pnand %p3123_p12, %p3120_p3 }
 0x109   : > { %3128 = shalt.err (!%p3125_p13)
}
 0x10a   : > { %s3129_s25 = scalar_lea.vmem %s465_s22, 16  ;;  %s3136_s24 = scalar_lea.vmem %s465_s22, 32 }
 0x10b   : > { %p3130_p0 = scmp.ne.s32.totalorder %s465_s22, %s3129_s25  ;;  %p3137_p7 = scmp.lt.s32.totalorder %s465_s22, %s465_s22 }
 0x10c   : > { %p3138_p9 = scmp.lt.s32.totalorder %s3136_s24, %s3129_s25 }
 0x10d   : > { %p3132_p2 = pnand %p3130_p0, %p3445_p8 }
 0x10e   : > { %p3139_p4 = por %p3138_p9, %p3137_p7 }
 0x10f   : > { %p3133_p5 = pneg %p3132_p2 }
 0x111   : > { %p3140_p10 = pnand %p3139_p4, %p3133_p5 }
 0x113   : > { %3143 = shalt.err (!%p3140_p10)
}
 0x114   : > { %2617 = dma.hbm_to_vmem [thread:$0]  (!%p3429_p6), %s4046_s10, 16, %s465_s22, [#allocation18]  }
 0x115   : > { %s3144_s19 = scalar_lea.hbm %s4048_s12, 16 }
 0x116   : > { %p3145_p11 = scmp.ne.s32.totalorder %s4048_s12, %s3144_s19  ;;  %p3151_p12 = scmp.lt.u32.totalorder %s3144_s19, %s4048_s12 }
 0x118   : > { %p3147_p1 = pnand %p3145_p11, %p3445_p8 }
 0x11a   : > { %p3148_p3 = pneg %p3147_p1 }
 0x11c   : > { %p3153_p13 = pnand %p3151_p12, %p3148_p3 }
 0x11e   : > { %3156 = shalt.err (!%p3153_p13)
}
 0x11f   : > { %s3157_s22 = scalar_lea.vmem %s3666_s29, 16  ;;  %s3164_s25 = scalar_lea.vmem %s3666_s29, 32 }
 0x120   : > { %p3158_p0 = scmp.ne.s32.totalorder %s3666_s29, %s3157_s22  ;;  %p3165_p7 = scmp.lt.s32.totalorder %s3666_s29, %s3666_s29 }
 0x121   : > { %p3166_p9 = scmp.lt.s32.totalorder %s3164_s25, %s3157_s22 }
 0x122   : > { %p3160_p2 = pnand %p3158_p0, %p3445_p8 }
 0x123   : > { %p3167_p4 = por %p3166_p9, %p3165_p7 }
 0x124   : > { %p3161_p5 = pneg %p3160_p2 }
 0x126   : > { %p3168_p10 = pnand %p3167_p4, %p3161_p5 }
 0x128   : > { %3171 = shalt.err (!%p3168_p10)
}
 0x129   : > { %s4077_s16 = sld [smem:[#allocation32_spill]]  ;;  %s4078_s23 = sld [smem:[#allocation33_spill]] }
 0x12a   : > { %2623 = dma.hbm_to_vmem [thread:$0]  (!%p3429_p6), %s4048_s12, 16, %s3666_s29, [#allocation21]  }
 0x12b   : > { %s2254_s18 = sadd.s32 4294967294, %s3292_s28   ;;  %s3712_s0 = sadd.s32 1, %s3292_s28  }
 0x12c   : > { %s39_s21 = ssub.s32 %s3292_s28, %s3712_s0  ;;  %s42_s19 = sadd.s32 1, %s3288_s27 }
 0x12d   : > { %p40_p8 = scmp.eq.s32.totalorder %s39_s21, 0  ;;  %p49_p11 = scmp.ne.s32.totalorder %s3288_s27, %s3284_s26 }
 0x12e   : > { %p50_p1 = scmp.eq.s32.totalorder %s3292_s28, 0  ;;  %p337_p2 = scmp.eq.s32.totalorder %s2254_s18, 1 }
 0x12f   : > { %p55_p3 = scmp.ne.s32.totalorder %s3284_s26, %s4077_s16  ;;  %p4080_p13 = scmp.eq.s32.totalorder %s4078_s23, 0 }
 0x130   : > { %s3723_s14 = scalar_select %p40_p8, %s3288_s27, %s42_s19  }
 0x131   : > { %p3725_p12 = por %p50_p1, %p49_p11  ;;  %p3731_p6 = por %p4080_p13, %p55_p3 }
 0x132   : > { %p331_p0 = scmp.eq.s32.totalorder %s4078_s23, 1  ;;  %p2644_p5 = scmp.lt.s32.totalorder %s3292_s28, 2 }
 0x133   : > { %s497_s20 = sand.u32 1, %s3288_s27   ;;  %p3742_p9 = por %p337_p2, %p55_p3 }
 0x134   : > { %p3738_p7 = por %p331_p0, %p49_p11  ;;  %s2269_s25 = sshll.u32 %s497_s20, 4 }
 0x135   : > { %s4083_s22 = scalar_select %p3742_p9, 1, 0 }
 0x136   : > { %s4082_s13 = scalar_select %p3738_p7, 1, 0 }
 0x137   : > { %s2374_s24 = sshll.u32 %s3292_s28, 8  ;;  %s4084_s21 = sld [smem:[#allocation35_spill]] }
 0x138   : > { %s501_s23 = scalar_lea.vmem [#allocation2], %s2269_s25  ;;  %p3756_p4 = pnand %p2644_p5, %p3725_p12 }
 0x139   : > { %s508_s18 = sshll.u32 %s501_s23, 4  ;;  %s3760_s1 = scalar_lea.sflag [#allocation3], %s497_s20  ;;  %s3752_s18 = int_to_ptr.vmem [resolvable:$true] %s508_s18 }
 0x13a   : > { %p3174_p8 = pneg %p3756_p4 }
 0x13d   : > { %s3750_s19 = scalar_lea.hbm %s4084_s21, %s2374_s24  ;;  %s3177_s17 = scalar_lea.hbm %s4084_s21, 512 }
 0x13e   : > { %s3172_s30 = scalar_lea.hbm %s3750_s19, 256  ;;  %p3178_p3 = scmp.lt.u32.totalorder %s3750_s19, %s4084_s21 }
 0x13f   : > { %p3173_p10 = scmp.ne.s32.totalorder %s3750_s19, %s3172_s30  ;;  %p3179_p12 = scmp.lt.u32.totalorder %s3177_s17, %s3172_s30 }
 0x140   : > { %p3181_p0 = scmp.lt.u32.totalorder %s3172_s30, %s3750_s19 }
 0x141   : > { %p3175_p11 = pnand %p3174_p8, %p3173_p10  ;;  %p3180_p13 = por %p3179_p12, %p3178_p3 }
 0x143   : > { %p3176_p1 = pneg %p3175_p11  ;;  %p3182_p2 = por %p3181_p0, %p3180_p13 }
 0x145   : > { %p3183_p5 = pnand %p3182_p2, %p3176_p1 }
 0x147   : > { %3186 = shalt.err (!%p3183_p5)
}
 0x148   : > { %s3187_s20 = scalar_lea.vmem %s3752_s18, 256  ;;  %s3312_s25 = smov [#allocation2]  }
 0x149   : > { %p3188_p10 = scmp.ne.s32.totalorder %s3752_s18, %s3187_s20  ;;  %s3192_s24 = sshll.u32 %s3312_s25, 4  ;;  %s3193_s24 = int_to_ptr.vmem [resolvable:$false] %s3192_s24 }
 0x14a   : > { %s3194_s16 = scalar_lea.vmem %s3193_s24, 512  ;;  %p3195_p7 = scmp.lt.s32.totalorder %s3752_s18, %s3193_s24 }
 0x14b   : > { %p3190_p11 = pnand %p3188_p10, %p3174_p8  ;;  %p3196_p3 = scmp.lt.s32.totalorder %s3194_s16, %s3187_s20 }
 0x14d   : > { %p3191_p9 = pneg %p3190_p11  ;;  %p3197_p12 = por %p3196_p3, %p3195_p7 }
 0x14f   : > { %p3198_p13 = pnand %p3197_p12, %p3191_p9 }
 0x151   : > { %3201 = shalt.err (!%p3198_p13)
}
 0x152   : > { %s4086_s30 = smov 8   ;;  %s4087_s17 = smov 128  }
 0x153   : > { %2627 = dma.hbm_to_vmem [thread:$0]  (!%p3756_p4), %s3750_s19, 256, %s3752_s18, %s3760_s1, %s4087_s17, %s4087_s17, %s4086_s30  }
 0x154   : > { %s4088_s23 = sld [smem:[#allocation34_spill]] }
 0x15a   : > { %p4089_p8 = scmp.ne.s32.totalorder %s4088_s23, 0 }
 0x15b   : > { %s3794_s25 = sand.u32 (!%p4089_p8), 1, %s3284_s26  }
 0x15c   : > { %520 = sbr.rel (%p4089_p8) target bundleno = 4112 (0x1010), region = 72  ;;  %s2273_s20 = sshll.u32 (!%p4089_p8), %s3794_s25, 4 }
 0x15d   : > { %s523_s24 = scalar_lea.sflag (!%p4089_p8), [#allocation3], %s3794_s25  ;;  %s3800_s15 = scalar_lea.vmem (!%p4089_p8), [#allocation2], %s2273_s20 }
 0x163   : > { %3247 = dma.done.wait (%p3731_p6), %s523_s24, 256  }
 0x164   : > { %3249 = vsyncadd (%p3731_p6), %s523_s24, 4294967040  ;;  %s4090_s1 = sld [smem:[#allocation33_spill]] }
 0x16a   : > { %p4091_p7 = scmp.eq.s32.totalorder %s4090_s1, 0 }
 0x16c   : > { %3251 = dma.done.wait (%p4091_p7), [#allocation6], 3120   ;;  %p4092_p9 = pmov %p4091_p7 }
 0x16d   : > { %p4093_p4 = pmov %p4091_p7 }
 0x16e   : > { %3253 = vsyncadd (%p4092_p9), [#allocation6], 4294964176 }
 0x16f   : > { %3255 = dma.done.wait (%p4093_p4), [#allocation9], 1040   ;;  %p4094_p1 = pmov %p4093_p4 }
 0x171   : > { %3257 = vsyncadd (%p4094_p1), [#allocation9], 4294966256  ;;  %p4095_p0 = pmov %p4094_p1 }
 0x173   : > { %3259 = dma.done.wait (%p4095_p0), [#allocation12], 32   ;;  %p4096_p2 = pmov %p4095_p0 }
 0x174   : > { %p4097_p6 = pmov %p4095_p0 }
 0x175   : > { %3261 = vsyncadd (%p4096_p2), [#allocation12], 4294967264 }
 0x176   : > { %3263 = dma.done.wait (%p4097_p6), [#allocation15], 2080   ;;  %p4098_p5 = pmov %p4095_p0 }
 0x177   : > { %p4099_p10 = pmov %p4095_p0 }
 0x178   : > { %3265 = vsyncadd (%p4098_p5), [#allocation15], 4294965216 }
 0x179   : > { %3267 = dma.done.wait (%p4099_p10), [#allocation18], 2064   ;;  %p4100_p11 = pmov %p4095_p0 }
 0x17a   : > { %p4101_p3 = pmov %p4095_p0 }
 0x17b   : > { %3269 = vsyncadd (%p4100_p11), [#allocation18], 4294965232 }
 0x17c   : > { %3271 = dma.done.wait (%p4101_p3), [#allocation21], 32   ;;  %p4102_p12 = pmov %p4095_p0 }
 0x17d   : > { %v3313_v0 = vmov 0   ;;  %v2716_v1 = vld [vmem:[#allocation5 + $0x4] ss:$12 sps:$4 sm:$0xff]   ;;  %v2718_v2 = vld [vmem:[#allocation5] ss:$12 sps:$4 sm:$0xff]   ;;  %v3314_v20 = vmov 0.0   ;;  %v655_v21 = vlaneseq }
 0x17e   : > { %3273 = vsyncadd (%p4102_p12), [#allocation21], 4294967264  ;;  %830 = vmatprep.mubr.bf16.mxu0 %v3313_v0  ;;  %798 = vmatprep.subr.bf16.mxu0 %v2716_v1  ;;  %v2719_v3 = vld [vmem:[#allocation5 + $0x1c] ss:$12 sps:$4 sm:$0xff]   ;;  %v2721_v4 = vld [vmem:[#allocation5 + $0x18] ss:$12 sps:$4 sm:$0xff]  }
 0x17f   : > { %799 = vmatpush1.bf16.msra.mxu0 %v2718_v2  ;;  %v2722_v5 = vld [vmem:[#allocation5 + $0x34] ss:$12 sps:$4 sm:$0xff]   ;;  %v2724_v6 = vld [vmem:[#allocation5 + $0x30] ss:$12 sps:$4 sm:$0xff]   ;;  %v2725_v7 = vld [vmem:[#allocation5 + $0x4c] ss:$12 sps:$4 sm:$0xff]   ;;  %2435 = vmatprep.subr.bf16.mxu1 %v3314_v20 }
 0x180   : > { %800 = vmatprep.subr.bf16.mxu0 %v2719_v3  ;;  %v2727_v8 = vld [vmem:[#allocation5 + $0x48] ss:$12 sps:$4 sm:$0xff]   ;;  %v2728_v9 = vld [vmem:[#allocation5 + $0x64] ss:$12 sps:$4 sm:$0xff]   ;;  %v2730_v10 = vld [vmem:[#allocation5 + $0x60] ss:$12 sps:$4 sm:$0xff]  }
 0x181   : > { %v2731_v11 = vld [vmem:[#allocation5 + $0x7c] ss:$12 sps:$4 sm:$0xff]   ;;  %v2733_v12 = vld [vmem:[#allocation5 + $0x78] ss:$12 sps:$4 sm:$0xff]   ;;  %v2734_v13 = vld [vmem:[#allocation5 + $0x94] ss:$12 sps:$4 sm:$0xff]  }
 0x182   : > { %v2736_v14 = vld [vmem:[#allocation5 + $0x90] ss:$12 sps:$4 sm:$0xff]   ;;  %v2737_v15 = vld [vmem:[#allocation5 + $0xac] ss:$12 sps:$4 sm:$0xff]   ;;  %v2739_v16 = vld [vmem:[#allocation5 + $0xa8] ss:$12 sps:$4 sm:$0xff]  }
 0x183   : > { %801 = vmatpush1.bf16.msra.mxu0 %v2721_v4  ;;  %v3832_v17 = vld [vmem:[%s3800_s15] sm:$0xff]  ;;  %v3835_v18 = vld [vmem:[%s3800_s15 + $0x8] sm:$0xff]  ;;  %vm3315_vm0 = vmmov 0   ;;  %v3848_v22 = vshrl.u32 %v655_v21, 7  ;;  %vm901_vm1 = vcmask 261120   ;;  %s3316_s29 = smov 96  }
 0x184   : > { %802 = vmatprep.subr.bf16.mxu0 %v2722_v5  ;;  %v3839_v19 = vpack.c.bf16 %v3835_v18, %v3832_v17  ;;  %2451 = vmatprep.mubr.msk.bf16.mxu1 %vm3315_vm0, %v3314_v20  ;;  %v3851_v24 = vld [vmem:[#allocation7] sm:$0x7]  ;;  %v2740_v39 = vld [vmem:[#allocation5 + $0x8] ss:$12 sps:$4 sm:$0xff]   ;;  %v2742_v41 = vld [vmem:[#allocation5 + $0x38] ss:$12 sps:$4 sm:$0xff]  }
 0x185   : > { %v657_v23 = vsub.s32 0, %v3848_v22  ;;  %v661_v25 = vsub.s32 1, %v3848_v22  ;;  %2436 = vmatpush3.bf16.msra.mxu1 %v2740_v39  ;;  %v2741_v40 = vld [vmem:[#allocation5 + $0x20] ss:$12 sps:$4 sm:$0xff]   ;;  %v2743_v42 = vld [vmem:[#allocation5 + $0x50] ss:$12 sps:$4 sm:$0xff]  }
 0x186   : > { %2437 = vmatprep.subr.bf16.mxu1 %v3314_v20  ;;  %v2744_v43 = vld [vmem:[#allocation5 + $0x68] ss:$12 sps:$4 sm:$0xff]   ;;  %v2745_v46 = vld [vmem:[#allocation5 + $0x80] ss:$12 sps:$4 sm:$0xff]   ;;  %v2746_v47 = vld [vmem:[#allocation5 + $0x98] ss:$12 sps:$4 sm:$0xff]  }
 0x187   : > { %803 = vmatpush1.bf16.msra.mxu0 %v2724_v6  ;;  %v658_v26 = vrot.slane %v3851_v24, %v657_v23  ;;  %v662_v28 = vrot.slane %v3851_v24, %v661_v25  ;;  %v2747_v49 = vld [vmem:[#allocation5 + $0xb0] ss:$12 sps:$4 sm:$0xff]   ;;  %vm951_vm2 = vcmask 130048   ;;  %s3317_s19 = smov 64   ;;  %s3318_s18 = smov 32  }
 0x188   : > { %804 = vmatprep.subr.bf16.mxu0 %v2725_v7  ;;  %s2375_s16 = sshll.u32 %s4090_s1, 8  ;;  %s616_s30 = scalar_lea.vmem [#allocation23], %s2273_s20 }
 0x189   : > { %2438 = vmatpush3.bf16.msra.mxu1 %v2741_v40  ;;  %s2067_s17 = sshll.u32 %s616_s30, 4  ;;  %s4103_s15 = sld [smem:[#allocation38_spill]]  ;;  %s3992_s17 = int_to_ptr.vmem [resolvable:$true] %s2067_s17 }
 0x18a   : > { %2439 = vmatprep.subr.bf16.mxu1 %v3314_v20  ;;  %p4104_p8 = scmp.ne.s32.totalorder %s4082_s13, 0  ;;  %s3319_s20 = smov [#allocation23]  }
 0x18b   : > { %805 = vmatpush1.bf16.msra.mxu0 %v2727_v8  ;;  %s3206_s1 = sshll.u32 %s3319_s20, 4  ;;  %s3207_s1 = int_to_ptr.vmem [resolvable:$false] %s3206_s1 }
 0x18c   : > { %806 = vmatprep.subr.bf16.mxu0 %v2728_v9  ;;  %v665_v9 = vsub.s32 2, %v3848_v22  ;;  %s3208_s2 = scalar_lea.vmem %s3207_s1, 512  ;;  %p3209_p4 = scmp.lt.s32.totalorder %s3992_s17, %s3207_s1 }
 0x18d   : > { %2440 = vmatpush3.bf16.msra.mxu1 %v2742_v41 }
 0x18e   : > { %2441 = vmatprep.subr.bf16.mxu1 %v3314_v20 }
 0x18f   : > { %807 = vmatpush1.bf16.msra.mxu0 %v2730_v10 }
 0x190   : > { %808 = vmatprep.subr.bf16.mxu0 %v2731_v11 }
 0x191   : > { %2442 = vmatpush3.bf16.msra.mxu1 %v2743_v42 }
 0x192   : > { %2443 = vmatprep.subr.bf16.mxu1 %v3314_v20 }
 0x193   : > { %809 = vmatpush1.bf16.msra.mxu0 %v2733_v12  ;;  %v666_v12 = vrot.slane %v3851_v24, %v665_v9 }
 0x194   : > { %810 = vmatprep.subr.bf16.mxu0 %v2734_v13 }
 0x195   : > { %2444 = vmatpush3.bf16.msra.mxu1 %v2744_v43 }
 0x196   : > { %2445 = vmatprep.subr.bf16.mxu1 %v3314_v20 }
 0x197   : > { %811 = vmatpush1.bf16.msra.mxu0 %v2736_v14 }
 0x198   : > { %812 = vmatprep.subr.bf16.mxu0 %v2737_v15 }
 0x199   : > { %2446 = vmatpush3.bf16.msra.mxu1 %v2745_v46 }
 0x19a   : > { %2447 = vmatprep.subr.bf16.mxu1 %v3314_v20 }
 0x19b   : > { %813 = vmatpush1.bf16.msra.mxu0 %v2739_v16 }
 0x19c   : > { %2455 = vmatprep.subr.bf16.mxu0 %v3314_v20 }
 0x19d   : > { %2448 = vmatpush3.bf16.msra.mxu1 %v2746_v47  ;;  %v2750_v47 = vld [vmem:[#allocation8 + $0x10] sm:$0xff]  }
 0x19e   : > { %831 = vmatmul.mubr.bf16.vlgmr.msra.gmra.mrb[0].mxu0 %v3839_v19  ;;  %2449 = vmatprep.subr.bf16.mxu1 %v3314_v20 }
 0x19f   : > { %2457 = vmatprep.mubr.msk.bf16.mxu0 %vm3315_vm0, %v3314_v20 }
 0x1a1   : > { %2450 = vmatpush3.bf16.msra.mxu1 %v2747_v49 }
 0x1a2   : > { %2461 = vmatprep.subr.bf16.mxu1 %v3314_v20 }
 0x1a4   : > { %2452 = vmatmul.mubr.bf16.vlgmr.msra.gmra.mrb[0].mxu1 %v3839_v19 }
 0x1a5   : > { %2463 = vmatprep.mubr.msk.bf16.mxu1 %vm3315_vm0, %v3314_v20 }
 0x271   : > { %v832_v27 = vpop.f32.mrb[0].mxu0 }
 0x272   : > { %v834_v29 = vpop.f32.mrb[1].mxu0  ;;  %v833_v31 = vadd.f32 %v832_v27, %v658_v26 }
 0x273   : > { %v836_v30 = vpop.f32.mrb[2].mxu0  ;;  %v835_v34 = vadd.f32 %v834_v29, %v662_v28 }
 0x274   : > { %v837_v32 = vadd.f32 %v836_v30, %v658_v26  ;;  %v838_v33 = vpop.f32.mrb[3].mxu0 }
 0x275   : > { %v839_v35 = vadd.f32 %v838_v33, %v662_v28 }
 0x276   : > { %v3860_v36 = vpack.c.bf16 %v837_v32, %v833_v31 }
 0x277   : > { %v3862_v37 = vpack.c.bf16 %v839_v35, %v835_v34  ;;  %v875_v10 = vpop.f32.mrb[0].mxu1 }
 0x278   : > { %v2453_v11 = vpop.f32.mrb[1].mxu1  ;;  %v876_v15 = vadd.f32 %v875_v10, %v666_v12 }
 0x279   : > { %1024 = vrot.lane.b32.xlu0 %v3862_v37, %s3316_s29  ;;  %v906_v38 = vsel %vm901_vm1, %v3862_v37, 0  ;;  %v878_v13 = vpop.f32.mrb[2].mxu1 }
 0x27a   : > { %2456 = vmatpush3.bf16.xpose.msra.mxu0 %v906_v38  ;;  %v2454_v14 = vpop.f32.mrb[3].mxu1  ;;  %v879_v16 = vadd.f32 %v878_v13, %v666_v12 }
 0x27b   : > { %2467 = vmatprep.subr.bf16.mxu0 %v3314_v20 }
 0x27c   : > { %v3899_v19 = vpack.c.bf16 %v879_v16, %v876_v15 }
 0x27d   : > { %1021 = vrot.lane.b32.xlu0 %v3860_v36, %s3316_s29 }
 0x27e   : > { %2462 = vmatpush3.bf16.msra.mxu1 %v3899_v19 }
 0x27f   : > { %2473 = vmatprep.subr.bf16.mxu1 %v3314_v20 }
 0x281   : > { %2458 = vmatmul.mubr.msk.bf16.vlgmr.msra.gmra.mrb[4].mxu0 %vm901_vm1, %v3860_v36 }
 0x282   : > { %2469 = vmatprep.mubr.msk.bf16.mxu0 %vm3315_vm0, %v3314_v20 }
 0x2eb   : > { %v1025_v44 = vpop.permute.xlu0 %1024 }
 0x2ec   : > { %v1030_v45 = vsel %vm901_vm1, %v1025_v44, 0 }
 0x2ed   : > { %2468 = vmatpush3.bf16.xpose.msra.mxu0 %v1030_v45 }
 0x2ee   : > { %2479 = vmatprep.subr.bf16.mxu0 %v3314_v20 }
 0x2ef   : > { %v1022_v48 = vpop.permute.xlu0 %1021 }
 0x2f4   : > { %2470 = vmatmul.mubr.msk.bf16.vlgmr.msra.gmra.mrb[8].mxu0 %vm901_vm1, %v1022_v48  ;;  %v2751_v48 = vld [vmem:[#allocation8 + $0x18] sm:$0xff]  }
 0x2f5   : > { %2483 = vmatprep.mubr.msk.bf16.mxu0 %vm3315_vm0, %v3314_v20  ;;  %2480 = vmatpush3.bf16.msra.mxu0 %v2750_v47  ;;  %v2752_v47 = vld [vmem:[#allocation8 + $0x20] sm:$0xff]  }
 0x2f6   : > { %2481 = vmatprep.subr.bf16.mxu0 %v3314_v20 }
 0x2f9   : > { %2482 = vmatpush3.bf16.msra.mxu0 %v2751_v48 }
 0x2fa   : > { %2495 = vmatprep.subr.bf16.mxu0 %v3314_v20 }
 0x354   : > { %v942_v50 = vpop.f32.mrb[4].mxu0 }
 0x355   : > { %v949_v51 = vmul.f32 0.17677669, %v942_v50  ;;  %v2459_v52 = vpop.f32.mrb[5].mxu0 }
 0x356   : > { %v945_v53 = vpop.f32.mrb[6].mxu0 }
 0x357   : > { %v950_v54 = vmul.f32 0.17677669, %v945_v53  ;;  %v2460_v55 = vpop.f32.mrb[7].mxu0  ;;  %v952_v56 = vsel %vm951_vm2, %v949_v51, -inf }
 0x358   : > { %953 = vmax.xlane.f32.xlu1 %v952_v56  ;;  %v2748_v56 = vld [vmem:[#allocation8] sm:$0xff]  }
 0x359   : > { %v955_v57 = vsel %vm951_vm2, %v950_v54, -inf }
 0x35c   : > { %956 = vmax.xlane.f32.xlu1 %v955_v57 }
 0x3c7   : > { %v1066_v58 = vpop.f32.mrb[8].mxu0 }
 0x3c8   : > { %v1073_v59 = vmul.f32 0.17677669, %v1066_v58  ;;  %v2471_v60 = vpop.f32.mrb[9].mxu0  ;;  %v2749_v58 = vld [vmem:[#allocation8 + $0x8] sm:$0xff]  }
 0x3c9   : > { %v1069_v61 = vpop.f32.mrb[10].mxu0 }
 0x3ca   : > { %v1074_v62 = vmul.f32 0.17677669, %v1069_v61  ;;  %v2472_v63 = vpop.f32.mrb[11].mxu0  ;;  %v1075_v1 = vsel %vm951_vm2, %v1073_v59, -inf }
 0x3cb   : > { %1076 = vmax.xlane.f32.xlu0 %v1075_v1 }
 0x3cc   : > { %v1078_v2 = vsel %vm951_vm2, %v1074_v62, -inf }
 0x3cd   : > { %1079 = vmax.xlane.f32.xlu1 %v1078_v2 }
 0x3e1   : > { %1261 = vrot.lane.b32.xlu0 %v3862_v37, %s3317_s19 }
 0x3e5   : > { %v954_v3 = vpop.xlane.xlu1 %953 }
 0x3e6   : > { %v958_v4 = vsub.f32 %v949_v51, %v954_v3 }
 0x3e8   : > { %v960_v5 = vmul.f32 1.442695, %v958_v4 }
 0x3e9   : > { %v957_v6 = vpop.xlane.xlu1 %956 }
 0x3ea   : > { %2796 = vpow2.f32 %v960_v5  ;;  %v959_v7 = vsub.f32 %v950_v54, %v957_v6 }
 0x3ec   : > { %v962_v8 = vmul.f32 1.442695, %v959_v7 }
 0x3ee   : > { %2798 = vpow2.f32 %v962_v8 }
 0x3f4   : > { %v2797_v21 = vpop.eup %2796 }
 0x3f5   : > { %v964_v26 = vsel %vm951_vm2, %v2797_v21, 0.0 }
 0x3f6   : > { %965 = vadd.xlane.f32.xlu1 %v964_v26 }
 0x3f8   : > { %v2799_v27 = vpop.eup %2798 }
 0x3f9   : > { %v967_v28 = vsel %vm951_vm2, %v2799_v27, 0.0 }
 0x3fa   : > { %968 = vadd.xlane.f32.xlu1 %v967_v28 }
 0x458   : > { %v1077_v29 = vpop.xlane.xlu0 %1076 }
 0x459   : > { %v1081_v24 = vsub.f32 %v1073_v59, %v1077_v29 }
 0x45a   : > { %v1080_v30 = vpop.xlane.xlu1 %1079 }
 0x45b   : > { %v1083_v31 = vmul.f32 1.442695, %v1081_v24  ;;  %v1082_v32 = vsub.f32 %v1074_v62, %v1080_v30 }
 0x45c   : > { %v1262_v3 = vpop.permute.xlu0 %1261 }
 0x45d   : > { %2800 = vpow2.f32 %v1083_v31  ;;  %v1085_v33 = vmul.f32 1.442695, %v1082_v32  ;;  %v1267_v7 = vsel %vm901_vm1, %v1262_v3, 0 }
 0x45f   : > { %2802 = vpow2.f32 %v1085_v33 }
 0x467   : > { %v2801_v34 = vpop.eup %2800 }
 0x468   : > { %v1087_v35 = vsel %vm951_vm2, %v2801_v34, 0.0 }
 0x469   : > { %v2803_v38 = vpop.eup %2802  ;;  %1088 = vadd.xlane.f32.xlu1 %v1087_v35 }
 0x46a   : > { %v1090_v39 = vsel %vm951_vm2, %v2803_v38, 0.0 }
 0x46d   : > { %1091 = vadd.xlane.f32.xlu1 %v1090_v39 }
 0x47e   : > { %1099 = vrot.lane.b32.xlu1 %v3899_v19, %s3316_s29  ;;  %s3990_s29 = scalar_lea.hbm %s4103_s15, %s2375_s16 }
 0x482   : > { %1259 = vrot.lane.b32.xlu1 %v3860_v36, %s3317_s19 }
 0x483   : > { %v966_v40 = vpop.xlane.xlu1 %965 }
 0x484   : > { %2804 = vrcp.f32 %v966_v40 }
 0x487   : > { %v969_v41 = vpop.xlane.xlu1 %968 }
 0x488   : > { %2806 = vrcp.f32 %v969_v41 }
 0x48e   : > { %v2805_v42 = vpop.eup %2804 }
 0x48f   : > { %v972_v44 = vmul.f32 %v2805_v42, %v2797_v21 }
 0x492   : > { %v2807_v43 = vpop.eup %2806 }
 0x493   : > { %v973_v45 = vmul.f32 %v2807_v43, %v2799_v27 }
 0x495   : > { %v974_v46 = vpack.c.bf16 %v973_v45, %v972_v44 }
 0x497   : > { %2464 = vmatmul.mubr.msk.bf16.vlgmr.msra.gmra.mrb[4].mxu1 %vm951_vm2, %v974_v46 }
 0x498   : > { %2475 = vmatprep.mubr.msk.bf16.mxu1 %vm3315_vm0, %v3314_v20 }
 0x4f6   : > { %v1089_v49 = vpop.xlane.xlu1 %1088 }
 0x4f7   : > { %2808 = vrcp.f32 %v1089_v49 }
 0x4fa   : > { %v1092_v50 = vpop.xlane.xlu1 %1091 }
 0x4fb   : > { %2810 = vrcp.f32 %v1092_v50 }
 0x4fe   : > { %v1100_v51 = vpop.permute.xlu1 %1099 }
 0x4ff   : > { %2474 = vmatpush3.bf16.msra.mxu1 %v1100_v51 }
 0x500   : > { %2487 = vmatprep.subr.bf16.mxu1 %v3314_v20 }
 0x501   : > { %v2809_v52 = vpop.eup %2808 }
 0x502   : > { %v1095_v54 = vmul.f32 %v2809_v52, %v2801_v34  ;;  %v1260_v8 = vpop.permute.xlu1 %1259 }
 0x505   : > { %v2811_v53 = vpop.eup %2810 }
 0x506   : > { %v1096_v55 = vmul.f32 %v2811_v53, %v2803_v38 }
 0x508   : > { %v1097_v57 = vpack.c.bf16 %v1096_v55, %v1095_v54 }
 0x50a   : > { %2476 = vmatmul.mubr.msk.bf16.vlgmr.msra.gmra.mrb[8].mxu1 %vm951_vm2, %v1097_v57 }
 0x50b   : > { %2488 = vmatpush3.bf16.msra.mxu1 %v2748_v56  ;;  %2491 = vmatprep.mubr.msk.bf16.mxu1 %vm3315_vm0, %v3314_v20 }
 0x50c   : > { %2489 = vmatprep.subr.bf16.mxu1 %v3314_v20 }
 0x50f   : > { %2490 = vmatpush3.bf16.msra.mxu1 %v2749_v58 }
 0x510   : > { %2501 = vmatprep.subr.bf16.mxu1 %v3314_v20 }
 0x56a   : > { %v1012_v59 = vpop.f32.mrb[4].mxu1 }
 0x56b   : > { %v2465_v60 = vpop.f32.mrb[5].mxu1 }
 0x56c   : > { %v1015_v61 = vpop.f32.mrb[6].mxu1 }
 0x56d   : > { %v1019_v62 = vpack.c.bf16 %v1015_v61, %v1012_v59  ;;  %v2466_v63 = vpop.f32.mrb[7].mxu1 }
 0x56f   : > { %2492 = vmatmul.mubr.msk.bf16.vlgmr.msra.gmra.mrb[12].mxu1 %vm901_vm1, %v1019_v62 }
 0x570   : > { %2503 = vmatprep.mubr.msk.bf16.mxu1 %vm3315_vm0, %v3314_v20 }
 0x5dd   : > { %v1139_v1 = vpop.f32.mrb[8].mxu1 }
 0x5de   : > { %v2477_v2 = vpop.f32.mrb[9].mxu1 }
 0x5df   : > { %v1142_v4 = vpop.f32.mrb[10].mxu1 }
 0x5e0   : > { %v1146_v5 = vpack.c.bf16 %v1142_v4, %v1139_v1  ;;  %v2478_v6 = vpop.f32.mrb[11].mxu1 }
 0x5e2   : > { %2484 = vmatmul.mubr.msk.bf16.vlgmr.msra.gmra.mrb[12].mxu0 %vm901_vm1, %v1146_v5 }
 0x5e3   : > { %2496 = vmatpush3.bf16.xpose.msra.mxu0 %v1267_v7  ;;  %2497 = vmatprep.mubr.msk.bf16.mxu0 %vm3315_vm0, %v3314_v20 }
 0x5e4   : > { %2507 = vmatprep.subr.bf16.mxu0 %v3314_v20 }
 0x5ea   : > { %2498 = vmatmul.mubr.msk.bf16.vlgmr.msra.gmra.mrb[16].mxu0 %vm901_vm1, %v1260_v8 }
 0x5eb   : > { %2511 = vmatprep.mubr.msk.bf16.mxu0 %vm3315_vm0, %v3314_v20  ;;  %2508 = vmatpush3.bf16.msra.mxu0 %v2752_v47 }
 0x5ec   : > { %2509 = vmatprep.subr.bf16.mxu0 %v3314_v20 }
 0x642   : > { %v1252_v9 = vpop.f32.mrb[12].mxu1 }
 0x643   : > { %v2493_v10 = vpop.f32.mrb[13].mxu1 }
 0x644   : > { %v1255_v11 = vpop.f32.mrb[14].mxu1 }
 0x645   : > { %v2494_v12 = vpop.f32.mrb[15].mxu1 }
 0x6b5   : > { %v1196_v13 = vpop.f32.mrb[12].mxu0 }
 0x6b6   : > { %v3933_v14 = vadd.f32 %v1252_v9, %v1196_v13  ;;  %v2485_v15 = vpop.f32.mrb[13].mxu0 }
 0x6b7   : > { %v1199_v16 = vpop.f32.mrb[14].mxu0 }
 0x6b8   : > { %v3935_v21 = vadd.f32 %v1255_v11, %v1199_v16  ;;  %v2486_v26 = vpop.f32.mrb[15].mxu0 }
 0x6bd   : > { %v1303_v27 = vpop.f32.mrb[16].mxu0 }
 0x6be   : > { %v1310_v28 = vmul.f32 0.17677669, %v1303_v27  ;;  %v2499_v29 = vpop.f32.mrb[17].mxu0 }
 0x6bf   : > { %v1306_v24 = vpop.f32.mrb[18].mxu0 }
 0x6c0   : > { %v1311_v30 = vmul.f32 0.17677669, %v1306_v24  ;;  %v2500_v31 = vpop.f32.mrb[19].mxu0  ;;  %v1312_v32 = vsel %vm951_vm2, %v1310_v28, -inf }
 0x6c1   : > { %1313 = vmax.xlane.f32.xlu1 %v1312_v32 }
 0x6c2   : > { %v1315_v33 = vsel %vm951_vm2, %v1311_v30, -inf }
 0x6c3   : > { %1316 = vmax.xlane.f32.xlu0 %v1315_v33 }
 0x6d9   : > { %1335 = vrot.lane.b32.xlu0 %v3899_v19, %s3317_s19  ;;  %s2054_s19 = scalar_lea.sflag [#allocation4], %s3794_s25 }
 0x74e   : > { %v1314_v34 = vpop.xlane.xlu1 %1313 }
 0x74f   : > { %v1318_v35 = vsub.f32 %v1310_v28, %v1314_v34  ;;  %v2754_v28 = vld [vmem:[#allocation8 + $0x30] sm:$0xff]  }
 0x750   : > { %v1317_v38 = vpop.xlane.xlu0 %1316 }
 0x751   : > { %v1320_v39 = vmul.f32 1.442695, %v1318_v35  ;;  %v1319_v40 = vsub.f32 %v1311_v30, %v1317_v38 }
 0x753   : > { %2812 = vpow2.f32 %v1320_v39  ;;  %v1322_v41 = vmul.f32 1.442695, %v1319_v40 }
 0x754   : > { %v1336_v42 = vpop.permute.xlu0 %1335 }
 0x755   : > { %2814 = vpow2.f32 %v1322_v41  ;;  %2502 = vmatpush3.bf16.msra.mxu1 %v1336_v42 }
 0x756   : > { %2515 = vmatprep.subr.bf16.mxu1 %v3314_v20 }
 0x75d   : > { %v2813_v43 = vpop.eup %2812 }
 0x75e   : > { %v1324_v44 = vsel %vm951_vm2, %v2813_v43, 0.0 }
 0x75f   : > { %v2815_v45 = vpop.eup %2814  ;;  %1325 = vadd.xlane.f32.xlu1 %v1324_v44 }
 0x760   : > { %v1327_v46 = vsel %vm951_vm2, %v2815_v45, 0.0 }
 0x763   : > { %1328 = vadd.xlane.f32.xlu1 %v1327_v46  ;;  %v2331_v46 = vld [vmem:[#allocation10] ss:$0 sm:$0xff] }
 0x774   : > { %1443 = vrot.lane.b32.xlu1 %v3862_v37, %s3318_s18  ;;  %v2753_v37 = vld [vmem:[#allocation8 + $0x28] sm:$0xff]  }
 0x775   : > { %2510 = vmatpush3.bf16.msra.mxu0 %v2753_v37  ;;  %v2759_v37 = vld [vmem:[#allocation14 + $0x10] ss:$8 sps:$4 sm:$0xff]  }
 0x776   : > { %2521 = vmatprep.subr.bf16.mxu0 %v3314_v20 }
 0x778   : > { %1441 = vrot.lane.b32.xlu1 %v3860_v36, %s3318_s18 }
 0x7ec   : > { %v1326_v48 = vpop.xlane.xlu1 %1325 }
 0x7ed   : > { %2816 = vrcp.f32 %v1326_v48 }
 0x7f0   : > { %v1329_v49 = vpop.xlane.xlu1 %1328 }
 0x7f1   : > { %2818 = vrcp.f32 %v1329_v49 }
 0x7f4   : > { %v1444_v54 = vpop.permute.xlu1 %1443 }
 0x7f5   : > { %v1449_v56 = vsel %vm901_vm1, %v1444_v54, 0 }
 0x7f7   : > { %v2817_v50 = vpop.eup %2816 }
 0x7f8   : > { %v1332_v52 = vmul.f32 %v2817_v50, %v2813_v43  ;;  %v1442_v36 = vpop.permute.xlu1 %1441 }
 0x7fb   : > { %v2819_v51 = vpop.eup %2818 }
 0x7fc   : > { %v1333_v53 = vmul.f32 %v2819_v51, %v2815_v45 }
 0x7fe   : > { %v1334_v55 = vpack.c.bf16 %v1333_v53, %v1332_v52 }
 0x800   : > { %2504 = vmatmul.mubr.msk.bf16.vlgmr.msra.gmra.mrb[16].mxu1 %vm951_vm2, %v1334_v55  ;;  %v2756_v55 = vld [vmem:[#allocation14] ss:$8 sps:$4 sm:$0xff]  }
 0x801   : > { %2516 = vmatpush3.bf16.xpose.msra.mxu1 %v1449_v56  ;;  %2517 = vmatprep.mubr.msk.bf16.mxu1 %vm3315_vm0, %v3314_v20  ;;  %v2758_v56 = vld [vmem:[#allocation14 + $0x4] ss:$8 sps:$4 sm:$0xff]  }
 0x802   : > { %2527 = vmatprep.subr.bf16.mxu1 %v3314_v20 }
 0x808   : > { %2518 = vmatmul.mubr.msk.bf16.vlgmr.msra.gmra.mrb[20].mxu1 %vm901_vm1, %v1442_v36  ;;  %v2761_v36 = vld [vmem:[#allocation14 + $0x14] ss:$8 sps:$4 sm:$0xff]  }
 0x809   : > { %2531 = vmatprep.mubr.msk.bf16.mxu1 %vm3315_vm0, %v3314_v20  ;;  %2528 = vmatpush3.bf16.msra.mxu1 %v2754_v28  ;;  %v2786_v28 = vld [vmem:[#allocation17 + $0x58] sm:$0xff]  }
 0x80a   : > { %2529 = vmatprep.subr.bf16.mxu1 %v3314_v20 }
 0x8d3   : > { %v1375_v57 = vpop.f32.mrb[16].mxu1 }
 0x8d4   : > { %v2505_v58 = vpop.f32.mrb[17].mxu1 }
 0x8d5   : > { %v1378_v59 = vpop.f32.mrb[18].mxu1 }
 0x8d6   : > { %v1382_v60 = vpack.c.bf16 %v1378_v59, %v1375_v57  ;;  %v2506_v61 = vpop.f32.mrb[19].mxu1 }
 0x8d8   : > { %2512 = vmatmul.mubr.msk.bf16.vlgmr.msra.gmra.mrb[20].mxu0 %vm901_vm1, %v1382_v60 }
 0x8d9   : > { %2523 = vmatprep.mubr.msk.bf16.mxu0 %vm3315_vm0, %v3314_v20  ;;  %v2755_v20 = vld [vmem:[#allocation8 + $0x38] sm:$0xff]  }
 0x8da   : > { %2530 = vmatpush3.bf16.msra.mxu1 %v2755_v20 }
 0x8db   : > { %v1485_v62 = vpop.f32.mrb[20].mxu1 }
 0x8dc   : > { %v1492_v63 = vmul.f32 0.17677669, %v1485_v62  ;;  %v2519_v1 = vpop.f32.mrb[21].mxu1 }
 0x8dd   : > { %v1488_v2 = vpop.f32.mrb[22].mxu1  ;;  %v2762_v1 = vld [vmem:[#allocation14 + $0x20] ss:$8 sps:$4 sm:$0xff]  }
 0x8de   : > { %v1493_v3 = vmul.f32 0.17677669, %v1488_v2  ;;  %v2520_v4 = vpop.f32.mrb[23].mxu1  ;;  %v1494_v5 = vsel %vm951_vm2, %v1492_v63, -inf  ;;  %v2767_v2 = vld [vmem:[#allocation14 + $0x34] ss:$8 sps:$4 sm:$0xff]  }
 0x8df   : > { %1495 = vmax.xlane.f32.xlu0 %v1494_v5  ;;  %v2770_v4 = vld [vmem:[#allocation14 + $0x44] ss:$8 sps:$4 sm:$0xff]   ;;  %v2768_v5 = vld [vmem:[#allocation14 + $0x40] ss:$8 sps:$4 sm:$0xff]  }
 0x8e0   : > { %v1497_v6 = vsel %vm951_vm2, %v1493_v3, -inf }
 0x8e1   : > { %1498 = vmax.xlane.f32.xlu1 %v1497_v6  ;;  %v2773_v6 = vld [vmem:[#allocation14 + $0x54] ss:$8 sps:$4 sm:$0xff]  }
 0x8f2   : > { %1517 = vrot.lane.b32.xlu1 %v3899_v19, %s3318_s18  ;;  %s3202_s18 = scalar_lea.vmem %s3992_s17, 256 }
 0x8f3   : > { %p3203_p13 = scmp.ne.s32.totalorder %s3992_s17, %s3202_s18  ;;  %p3210_p1 = scmp.lt.s32.totalorder %s3208_s2, %s3202_s18 }
 0x8f5   : > { %p3204_p7 = pnand %p3203_p13, %p4104_p8  ;;  %p3211_p0 = por %p3210_p1, %p3209_p4 }
 0x8f7   : > { %p3205_p9 = pneg %p3204_p7 }
 0x8f9   : > { %p3212_p2 = pnand %p3211_p0, %p3205_p9 }
 0x96c   : > { %v1496_v7 = vpop.xlane.xlu0 %1495 }
 0x96d   : > { %v1500_v8 = vsub.f32 %v1492_v63, %v1496_v7  ;;  %v2764_v63 = vld [vmem:[#allocation14 + $0x24] ss:$8 sps:$4 sm:$0xff]   ;;  %v2771_v7 = vld [vmem:[#allocation14 + $0x50] ss:$8 sps:$4 sm:$0xff]  }
 0x96e   : > { %v1499_v9 = vpop.xlane.xlu1 %1498 }
 0x96f   : > { %v1502_v10 = vmul.f32 1.442695, %v1500_v8  ;;  %v1501_v11 = vsub.f32 %v1493_v3, %v1499_v9  ;;  %v2765_v3 = vld [vmem:[#allocation14 + $0x30] ss:$8 sps:$4 sm:$0xff]   ;;  %v2776_v8 = vld [vmem:[#allocation14 + $0x64] ss:$8 sps:$4 sm:$0xff]  }
 0x970   : > { %v2774_v9 = vld [vmem:[#allocation14 + $0x60] ss:$8 sps:$4 sm:$0xff]  }
 0x971   : > { %2820 = vpow2.f32 %v1502_v10  ;;  %v1504_v12 = vmul.f32 1.442695, %v1501_v11  ;;  %v2779_v10 = vld [vmem:[#allocation14 + $0x74] ss:$8 sps:$4 sm:$0xff]   ;;  %v2777_v11 = vld [vmem:[#allocation14 + $0x70] ss:$8 sps:$4 sm:$0xff]  }
 0x972   : > { %v1518_v13 = vpop.permute.xlu1 %1517 }
 0x973   : > { %2822 = vpow2.f32 %v1504_v12  ;;  %2522 = vmatpush3.bf16.msra.mxu0 %v1518_v13  ;;  %v2780_v12 = vld [vmem:[#allocation17 + $0x40] sm:$0xff]  }
 0x974   : > { %1784 = vmatprep.subr.bf16.mxu0 %v2758_v56  ;;  %v2781_v13 = vld [vmem:[#allocation17] sm:$0xff]   ;;  %2413 = vmatprep.subr.bf16.mxu1 %v2780_v12 }
 0x97b   : > { %v2821_v15 = vpop.eup %2820 }
 0x97c   : > { %v1506_v16 = vsel %vm951_vm2, %v2821_v15, 0.0 }
 0x97d   : > { %v2823_v26 = vpop.eup %2822  ;;  %1507 = vadd.xlane.f32.xlu0 %v1506_v16  ;;  %v2783_v16 = vld [vmem:[#allocation17 + $0x8] sm:$0xff]  }
 0x97e   : > { %v1509_v27 = vsel %vm951_vm2, %v2823_v26, 0.0 }
 0x981   : > { %1510 = vadd.xlane.f32.xlu0 %v1509_v27  ;;  %v2785_v27 = vld [vmem:[#allocation17 + $0x10] sm:$0xff]  }
 0x9ab   : > { %v1432_v19 = vpop.f32.mrb[20].mxu0 }
 0x9ac   : > { %v1439_v29 = vadd.f32 %v1432_v19, %v3933_v14  ;;  %v2513_v24 = vpop.f32.mrb[21].mxu0  ;;  %v2787_v19 = vld [vmem:[#allocation17 + $0x18] sm:$0xff]  }
 0x9ad   : > { %v1435_v30 = vpop.f32.mrb[22].mxu0  ;;  %v2789_v24 = vld [vmem:[#allocation17 + $0x20] sm:$0xff]  }
 0x9ae   : > { %v1440_v31 = vadd.f32 %v1435_v30, %v3935_v21  ;;  %v2514_v32 = vpop.f32.mrb[23].mxu0  ;;  %v2790_v30 = vld [vmem:[#allocation17 + $0x68] sm:$0xff]  }
 0xa0a   : > { %v1508_v33 = vpop.xlane.xlu0 %1507 }
 0xa0b   : > { %2824 = vrcp.f32 %v1508_v33 }
 0xa0e   : > { %v1511_v34 = vpop.xlane.xlu0 %1510 }
 0xa0f   : > { %2826 = vrcp.f32 %v1511_v34 }
 0xa15   : > { %v2825_v35 = vpop.eup %2824 }
 0xa16   : > { %v1514_v39 = vmul.f32 %v2825_v35, %v2821_v15  ;;  %v2782_v15 = vld [vmem:[#allocation17 + $0x48] sm:$0xff]  }
 0xa19   : > { %v2827_v38 = vpop.eup %2826 }
 0xa1a   : > { %v1515_v40 = vmul.f32 %v2827_v38, %v2823_v26  ;;  %v2784_v26 = vld [vmem:[#allocation17 + $0x50] sm:$0xff]  }
 0xa1c   : > { %v1516_v41 = vpack.c.bf16 %v1515_v40, %v1514_v39 }
 0xa1e   : > { %2524 = vmatmul.mubr.msk.bf16.vlgmr.msra.gmra.mrb[24].mxu0 %vm951_vm2, %v1516_v41  ;;  %v2332_v41 = vld [vmem:[#allocation11] ss:$0 sm:$0xff] }
 0xa1f   : > { %1816 = vmatprep.mubr.bf16.mxu0 %v3313_v0  ;;  %1785 = vmatpush1.bf16.msra.mxu0 %v2756_v55 }
 0xa20   : > { %1786 = vmatprep.subr.bf16.mxu0 %v2761_v36 }
 0xa23   : > { %1787 = vmatpush1.bf16.msra.mxu0 %v2759_v37 }
 0xa24   : > { %1788 = vmatprep.subr.bf16.mxu0 %v2764_v63 }
 0xa27   : > { %1789 = vmatpush1.bf16.msra.mxu0 %v2762_v1  ;;  %v2350_v1 = vld [vmem:[#allocation19] ss:$0 sm:$0xff] }
 0xa28   : > { %1790 = vmatprep.subr.bf16.mxu0 %v2767_v2 }
 0xa2b   : > { %1791 = vmatpush1.bf16.msra.mxu0 %v2765_v3 }
 0xa2c   : > { %1792 = vmatprep.subr.bf16.mxu0 %v2770_v4 }
 0xa2f   : > { %1793 = vmatpush1.bf16.msra.mxu0 %v2768_v5 }
 0xa30   : > { %1794 = vmatprep.subr.bf16.mxu0 %v2773_v6 }
 0xa33   : > { %1795 = vmatpush1.bf16.msra.mxu0 %v2771_v7 }
 0xa34   : > { %1796 = vmatprep.subr.bf16.mxu0 %v2776_v8 }
 0xa37   : > { %1797 = vmatpush1.bf16.msra.mxu0 %v2774_v9 }
 0xa38   : > { %1798 = vmatprep.subr.bf16.mxu0 %v2779_v10 }
 0xa3b   : > { %1799 = vmatpush1.bf16.msra.mxu0 %v2777_v11 }
 0xaf1   : > { %v1557_v14 = vpop.f32.mrb[24].mxu0 }
 0xaf2   : > { %v2525_v42 = vpop.f32.mrb[25].mxu0 }
 0xaf3   : > { %v1560_v43 = vpop.f32.mrb[26].mxu0 }
 0xaf4   : > { %v1564_v21 = vpack.c.bf16 %v1560_v43, %v1557_v14  ;;  %v2526_v44 = vpop.f32.mrb[27].mxu0  ;;  %v2333_v43 = vld [vmem:[#allocation13] ss:$0 sm:$0xff] }
 0xaf6   : > { %2532 = vmatmul.mubr.msk.bf16.vlgmr.msra.gmra.mrb[24].mxu1 %vm901_vm1, %v1564_v21 }
 0xaf7   : > { %2414 = vmatpush3.bf16.msra.mxu1 %v2781_v13 }
 0xaf8   : > { %2415 = vmatprep.subr.bf16.mxu1 %v2782_v15 }
 0xafb   : > { %2416 = vmatpush3.bf16.msra.mxu1 %v2783_v16 }
 0xafc   : > { %2417 = vmatprep.subr.bf16.mxu1 %v2784_v26 }
 0xaff   : > { %2418 = vmatpush3.bf16.msra.mxu1 %v2785_v27 }
 0xb00   : > { %2419 = vmatprep.subr.bf16.mxu1 %v2786_v28 }
 0xb03   : > { %2420 = vmatpush3.bf16.msra.mxu1 %v2787_v19 }
 0xbc9   : > { %v1614_v45 = vpop.f32.mrb[24].mxu1 }
 0xbca   : > { %v1621_v47 = vadd.f32 %v1614_v45, %v1439_v29  ;;  %v2533_v48 = vpop.f32.mrb[25].mxu1  ;;  %v2788_v29 = vld [vmem:[#allocation17 + $0x60] sm:$0xff]  }
 0xbcb   : > { %v1617_v49 = vpop.f32.mrb[26].mxu1  ;;  %2421 = vmatprep.subr.bf16.mxu1 %v2788_v29  ;;  %v2792_v48 = vld [vmem:[#allocation17 + $0x70] sm:$0xff]  }
 0xbcc   : > { %v1630_v50 = vadd.f32 %v2331_v46, %v1621_v47  ;;  %v1622_v51 = vadd.f32 %v1617_v49, %v1440_v31  ;;  %v2534_v52 = vpop.f32.mrb[27].mxu1  ;;  %2422 = vmatpush3.bf16.msra.mxu1 %v2789_v24  ;;  %v2791_v47 = vld [vmem:[#allocation17 + $0x28] sm:$0xff]   ;;  %v2793_v49 = vld [vmem:[#allocation17 + $0x30] sm:$0xff]  }
 0xbcd   : > { %2423 = vmatprep.subr.bf16.mxu1 %v2790_v30  ;;  %v1692_v52 = vld [vmem:[#allocation16] sm:$0x3] }
 0xbce   : > { %v1631_v53 = vadd.f32 %v2331_v46, %v1622_v51  ;;  %v1632_v0 = vadd.f32 %v1630_v50, %v3832_v17  ;;  %v2794_v50 = vld [vmem:[#allocation17 + $0x78] sm:$0xff]  }
 0xbcf   : > { %v2795_v51 = vld [vmem:[#allocation17 + $0x38] sm:$0xff]  }
 0xbd0   : > { %1634 = vadd.xlane.f32.xlu0 %v1632_v0  ;;  %v1633_v54 = vadd.f32 %v1631_v53, %v3835_v18  ;;  %2424 = vmatpush3.bf16.msra.mxu1 %v2791_v47  ;;  %v1697_v53 = vrot.slane %v1692_v52, %v657_v23 }
 0xbd1   : > { %2425 = vmatprep.subr.bf16.mxu1 %v2792_v48 }
 0xbd4   : > { %1636 = vadd.xlane.f32.xlu0 %v1633_v54  ;;  %2426 = vmatpush3.bf16.msra.mxu1 %v2793_v49 }
 0xbd5   : > { %2427 = vmatprep.subr.bf16.mxu1 %v2794_v50 }
 0xbd8   : > { %2428 = vmatpush3.bf16.msra.mxu1 %v2795_v51 }
 0xc5d   : > { %v1635_v57 = vpop.xlane.xlu0 %1634 }
 0xc5e   : > { %v1639_v58 = vmul.f32 0.0078125, %v1635_v57 }
 0xc60   : > { %v3975_v59 = vsub.f32 %v1632_v0, %v1639_v58  ;;  %v1701_v0 = vrot.slane %v1692_v52, %v661_v25 }
 0xc61   : > { %v1637_v60 = vpop.xlane.xlu0 %1636 }
 0xc62   : > { %v1640_v61 = vmul.f32 0.0078125, %v1637_v60  ;;  %v1643_v17 = vmul.f32 %v3975_v59, %v3975_v59 }
 0xc64   : > { %v1642_v62 = vsub.f32 %v1633_v54, %v1640_v61  ;;  %1645 = vadd.xlane.f32.xlu0 %v1643_v17 }
 0xc66   : > { %v1644_v18 = vmul.f32 %v1642_v62, %v1642_v62 }
 0xc68   : > { %1647 = vadd.xlane.f32.xlu0 %v1644_v18 }
 0xcf1   : > { %v1646_v31 = vpop.xlane.xlu0 %1645 }
 0xcf2   : > { %v1649_v32 = vmul.f32 0.0078125, %v1646_v31 }
 0xcf4   : > { %v1651_v33 = vadd.f32 1e-05, %v1649_v32  ;;  %v2367_v32 = vld [vmem:[#allocation20] ss:$0 sm:$0xff] }
 0xcf5   : > { %v1648_v34 = vpop.xlane.xlu0 %1647 }
 0xcf6   : > { %2828 = vrsqrt.f32 %v1651_v33  ;;  %v1650_v35 = vmul.f32 0.0078125, %v1648_v34  ;;  %v2368_v34 = vld [vmem:[#allocation22] ss:$0 sm:$0xff] }
 0xcf8   : > { %v1652_v38 = vadd.f32 1e-05, %v1650_v35 }
 0xcfa   : > { %2830 = vrsqrt.f32 %v1652_v38 }
 0xd00   : > { %v2829_v39 = vpop.eup %2828 }
 0xd01   : > { %v1655_v40 = vmul.f32 %v2829_v39, %v3975_v59 }
 0xd03   : > { %v1664_v42 = vmul.f32 %v2332_v41, %v1655_v40 }
 0xd04   : > { %v2831_v20 = vpop.eup %2830 }
 0xd05   : > { %v1656_v14 = vmul.f32 %v2831_v20, %v1642_v62  ;;  %v1673_v44 = vadd.f32 %v2333_v43, %v1664_v42 }
 0xd07   : > { %v1665_v21 = vmul.f32 %v2332_v41, %v1656_v14 }
 0xd09   : > { %v1674_v45 = vadd.f32 %v2333_v43, %v1665_v21 }
 0xd0b   : > { %v1675_v46 = vpack.c.bf16 %v1674_v45, %v1673_v44 }
 0xd0d   : > { %1817 = vmatmul.mubr.bf16.vlgmr.msra.gmra.mrb[28].mxu0 %v1675_v46 }
 0xde0   : > { %v1818_v54 = vpop.f32.mrb[28].mxu0 }
 0xde1   : > { %v1819_v55 = vadd.f32 %v1818_v54, %v1697_v53  ;;  %v1820_v56 = vpop.f32.mrb[29].mxu0 }
 0xde2   : > { %v1821_v36 = vadd.f32 %v1820_v56, %v1701_v0  ;;  %v1822_v37 = vpop.f32.mrb[30].mxu0 }
 0xde3   : > { %v1823_v57 = vadd.f32 %v1822_v37, %v1697_v53  ;;  %v1824_v58 = vpop.f32.mrb[31].mxu0  ;;  %v1827_v60 = vmax.f32 %v1819_v55, 0.0 }
 0xde4   : > { %v1825_v59 = vadd.f32 %v1824_v58, %v1701_v0  ;;  %v1828_v17 = vmax.f32 %v1821_v36, 0.0 }
 0xde5   : > { %v1829_v61 = vmax.f32 %v1823_v57, 0.0 }
 0xde6   : > { %v1830_v62 = vmax.f32 %v1825_v59, 0.0 }
 0xde7   : > { %v1831_v18 = vpack.c.bf16 %v1829_v61, %v1827_v60 }
 0xde8   : > { %v1832_v63 = vpack.c.bf16 %v1830_v62, %v1828_v17 }
 0xdea   : > { %2000 = vmatprep.mubr.bf16.mxu1 %v1832_v63 }
 0xdeb   : > { %2001 = vmatmul.mubr.bf16.vlgmr.msra.gmra.mrb[28].mxu1 %v1831_v18 }
 0xebe   : > { %v2429_v23 = vpop.f32.mrb[28].mxu1 }
 0xebf   : > { %v2430_v22 = vpop.f32.mrb[29].mxu1 }
 0xec0   : > { %v2431_v25 = vadd.f32 %v2430_v22, %v2429_v23  ;;  %v2432_v2 = vpop.f32.mrb[30].mxu1 }
 0xec1   : > { %v2433_v3 = vpop.f32.mrb[31].mxu1 }
 0xec2   : > { %v2003_v4 = vadd.f32 %v2431_v25, %v2350_v1  ;;  %v2434_v5 = vadd.f32 %v2433_v3, %v2432_v2 }
 0xec4   : > { %v2006_v6 = vadd.f32 %v2434_v5, %v2350_v1  ;;  %v2009_v7 = vadd.f32 %v2003_v4, %v1673_v44 }
 0xec6   : > { %2011 = vadd.xlane.f32.xlu1 %v2009_v7  ;;  %v2010_v8 = vadd.f32 %v2006_v6, %v1674_v45 }
 0xec8   : > { %2013 = vadd.xlane.f32.xlu0 %v2010_v8 }
 0xf53   : > { %v2012_v9 = vpop.xlane.xlu1 %2011 }
 0xf54   : > { %v2015_v10 = vmul.f32 0.0078125, %v2012_v9 }
 0xf55   : > { %v2014_v11 = vpop.xlane.xlu0 %2013 }
 0xf56   : > { %v2017_v12 = vsub.f32 %v2009_v7, %v2015_v10  ;;  %v2016_v13 = vmul.f32 0.0078125, %v2014_v11 }
 0xf58   : > { %v2018_v15 = vsub.f32 %v2010_v8, %v2016_v13  ;;  %v2019_v16 = vmul.f32 %v2017_v12, %v2017_v12 }
 0xf5a   : > { %2021 = vadd.xlane.f32.xlu0 %v2019_v16  ;;  %v2020_v26 = vmul.f32 %v2018_v15, %v2018_v15 }
 0xf5e   : > { %2023 = vadd.xlane.f32.xlu0 %v2020_v26 }
 0xfe7   : > { %v2022_v27 = vpop.xlane.xlu0 %2021 }
 0xfe8   : > { %v2025_v28 = vmul.f32 0.0078125, %v2022_v27 }
 0xfea   : > { %v2027_v19 = vadd.f32 1e-05, %v2025_v28 }
 0xfeb   : > { %v2024_v29 = vpop.xlane.xlu0 %2023 }
 0xfec   : > { %2832 = vrsqrt.f32 %v2027_v19  ;;  %v2026_v24 = vmul.f32 0.0078125, %v2024_v29 }
 0xfee   : > { %v2028_v30 = vadd.f32 1e-05, %v2026_v24 }
 0xff0   : > { %2834 = vrsqrt.f32 %v2028_v30 }
 0xff6   : > { %v2833_v31 = vpop.eup %2832 }
 0xff7   : > { %v2031_v33 = vmul.f32 %v2833_v31, %v2017_v12 }
 0xff9   : > { %v2040_v35 = vmul.f32 %v2367_v32, %v2031_v33 }
 0xffa   : > { %v2835_v38 = vpop.eup %2834 }
 0xffb   : > { %v2049_v39 = vadd.f32 %v2368_v34, %v2040_v35  ;;  %v2032_v40 = vmul.f32 %v2835_v38, %v2018_v15 }
 0xffd   : > { %v2041_v41 = vmul.f32 %v2367_v32, %v2032_v40  ;;  %2051 = vst [vmem:[%s616_s30] sm:$0xff] %v2049_v39 }
 0xfff   : > { %v2050_v20 = vadd.f32 %v2368_v34, %v2041_v41 }
0x1001   : > { %2052 = vst [vmem:[%s616_s30 + $0x8] sm:$0xff] %v2050_v20 }
0x1002   : > { %3215 = shalt.err (!%p3212_p2)
}
0x1003   : > { %s3216_s16 = scalar_lea.hbm %s3990_s29, 256  ;;  %s3220_s24 = scalar_lea.hbm %s4103_s15, 512 }
0x1004   : > { %p3217_p6 = scmp.ne.s32.totalorder %s3990_s29, %s3216_s16  ;;  %p3221_p11 = scmp.lt.u32.totalorder %s3990_s29, %s4103_s15 }
0x1005   : > { %p3222_p3 = scmp.lt.u32.totalorder %s3220_s24, %s3216_s16  ;;  %p3224_p13 = scmp.lt.u32.totalorder %s3216_s16, %s3990_s29 }
0x1006   : > { %p3218_p5 = pnand %p3217_p6, %p4104_p8 }
0x1007   : > { %p3223_p12 = por %p3222_p3, %p3221_p11 }
0x1008   : > { %p3219_p10 = pneg %p3218_p5 }
0x1009   : > { %p3225_p7 = por %p3224_p13, %p3223_p12 }
0x100b   : > { %p3226_p9 = pnand %p3225_p7, %p3219_p10 }
0x100d   : > { %3229 = shalt.err (!%p3226_p9)
}
0x100e   : > { %s3320_s2 = smov 128   ;;  %s3321_s18 = smov 8  }
0x100f   : > { %2585 = dma.vmem_to_hbm [thread:$0]  (%p4104_p8), %s3992_s17, 256, %s3990_s29, %s2054_s19, %s3320_s2, %s3320_s2, %s3321_s18  }
0x1010 PF: > { %s4105_s30 = sld [smem:[#allocation32_spill]]  ;;  %p4106_p4 = scmp.ne.s32.totalorder %s4083_s22, 0 }
0x1011   : > { %p4107_p1 = scmp.ge.s32.totalorder %s3292_s28, 2 }
0x1013   : > { %p2629_p0 = pnand %p4107_p1, %p4106_p4 }
0x1016   : > { %s2082_s23 = sand.u32 1, %s4105_s30  }
0x1017   : > { %s2083_s16 = scalar_lea.sflag [#allocation4], %s2082_s23 }
0x1018   : > { %3275 = dma.done.wait (!%p2629_p0), %s2083_s16, 256  }
0x1019   : > { %3277 = vsyncadd (!%p2629_p0), %s2083_s16, 4294967040  ;;  %p32_p2 = scmp.ge.s32.totalorder %s3712_s0, 4   ;;  %s4108_s25 = smov %s3284_s26 }
0x101a   : > { %s4109_s26 = smov %s3288_s27  ;;  %s4110_s27 = smov %s3723_s14 }
0x101b   : > { %s4111_s28 = smov %s3712_s0  ;;  %34 = sbr.rel (!%p32_p2) target bundleno = 16 (0x10), region = 165 }
0x1022   :  { %2088 = vsyncpa [#allocation3], 1 }
0x1023   :  { %2090 = vsyncpa [#allocation3 + $0x1], 1 }
0x1024   :  { %2091 = vsyncpa [#allocation6], 1 }
0x1025   :  { %2092 = vsyncpa [#allocation9], 1 }
0x1026   :  { %2093 = vsyncpa [#allocation12], 1 }
0x1027   :  { %2094 = vsyncpa [#allocation15], 1 }
0x1028   :  { %2095 = vsyncpa [#allocation18], 1 }
0x1029   :  { %2096 = vsyncpa [#allocation21], 1 }
0x102a   :  { %2097 = vsyncpa [#allocation4], 1 }
0x102b   :  { %2099 = vsyncpa [#allocation4 + $0x1], 1 }

</bundles_post_ra>
